<compile_context>
chip_gen: v6e
topology: v6e:2x2x1
jax: 0.10.0
libtpu: 0.0.40
codegen_flags: <defaults>
</compile_context>

<pallas_src>
import functools
import math

import jax
import jax.numpy as jnp
from jax.experimental import pallas as pl
from jax.experimental.pallas import tpu as pltpu

# ----------------------------- model config --------------------------------
VOCAB = 100
TYPE_VOCAB = 2
MAX_POS = 16
HIDDEN = 32
NUM_HEADS = 2
HEAD_DIM = HIDDEN // NUM_HEADS
INTERMEDIATE = 64
NUM_LAYERS = 2
NB_CLASS = 1
LN_EPS = 1e-12          # matches HF/Paddle ERNIE config (kept for fidelity)

OUT_ROWS = 8            # sublane-padded output rows
OUT_LANES = 128         # lane-dense output width


# ----------------------------- kernel helpers -------------------------------
def _layer_norm(x, g, b):
    mu = jnp.mean(x, axis=-1, keepdims=True)
    var = jnp.mean((x - mu) * (x - mu), axis=-1, keepdims=True)
    return (x - mu) * jax.lax.rsqrt(var + LN_EPS) * g + b


def _gelu(x):
    # TODO(synk): HF/Paddle ERNIE uses exact erf GELU; tanh approximation kept (~1e-3 drift).
    return 0.5 * x * (1.0 + jnp.tanh(0.7978845608028654 * (x + 0.044715 * x * x * x)))


# ----------------------------- fused per-layer kernel ------------------------
def ernie_layer_kernel(
    emb_ref, keep_ref, emb_g_ref, emb_b_ref,
    wq_ref, bq_ref, wk_ref, bk_ref, wv_ref, bv_ref, wo_ref, bo_ref,
    g1_ref, be1_ref, w1_ref, b1_ref, w2_ref, b2_ref, g2_ref, be2_ref,
    wp_ref, bp_ref, wc_ref, bc_ref,
    o_ref,
    x_ref,                                    # persistent VMEM scratch [B*S, H] f32
    *, num_heads, head_dim, batch, seq, nb_class,
):
    l = pl.program_id(0)
    scale = 1.0 / math.sqrt(head_dim)
    bf16 = jnp.bfloat16

    # ---- layer 0: embedding LayerNorm initializes the resident activation slab ----
    @pl.when(l == 0)
    def _init():
        x0 = emb_ref[...].astype(jnp.float32)
        x_ref[...] = _layer_norm(x0, emb_g_ref[...], emb_b_ref[...])
        o_ref[...] = jnp.zeros_like(o_ref)

    x = x_ref[...]                            # [B*S, H] f32, VMEM-resident
    xb = x.astype(bf16)

    # ---- self attention: whole-batch projections (heads folded), bf16 MXU / f32 acc ----
    q = jnp.dot(xb, wq_ref[0], preferred_element_type=jnp.float32) + bq_ref[0]
    k = jnp.dot(xb, wk_ref[0], preferred_element_type=jnp.float32) + bk_ref[0]
    v = jnp.dot(xb, wv_ref[0], preferred_element_type=jnp.float32) + bv_ref[0]
    q = q * scale                             # fold 1/sqrt(dH) into q once (f32)

    # head-major slabs [nh, B*S, hd] (one relayout per tensor per layer)
    qs = jnp.stack([q[:, h * head_dim:(h + 1) * head_dim] for h in range(num_heads)], 0).astype(bf16)
    ks = jnp.stack([k[:, h * head_dim:(h + 1) * head_dim] for h in range(num_heads)], 0).astype(bf16)
    vs = jnp.stack([v[:, h * head_dim:(h + 1) * head_dim] for h in range(num_heads)], 0).astype(bf16)

    # in-kernel key-padding bias: 0 where keep==1, -1e9 where keep==0   (hoisted out of loops)
    key_bias = (keep_ref[...] - 1.0) * 1e9    # [1, B*S] f32

    # ---- block-diagonal attention: per-example [nh, S, S] (no BxS x BxS dense scores) ----
    ctx_rows = []
    for b in range(batch):                    # static unroll over small B
        lo, hi = b * seq, (b + 1) * seq
        qb, kb, vb = qs[:, lo:hi, :], ks[:, lo:hi, :], vs[:, lo:hi, :]
        s = jnp.einsum('hqd,hkd->hqk', qb, kb,
                       preferred_element_type=jnp.float32)          # [nh, S, S]
        s = s + key_bias[:, lo:hi]                                   # broadcast over keys
        s = s - jnp.max(s, axis=-1, keepdims=True)
        p = jnp.exp(s)
        p = p * pl.reciprocal(jnp.sum(p, axis=-1, keepdims=True), approx=True)
        cb = jnp.einsum('hqk,hkd->hqd', p.astype(bf16), vb,
                        preferred_element_type=jnp.float32)          # [nh, S, hd]
        ctx_rows.append(jnp.concatenate([cb[h] for h in range(num_heads)], axis=-1))  # [S, H]
    ctx = jnp.concatenate(ctx_rows, axis=0)                          # [B*S, H]

    # single output projection for all heads / all examples
    attn = jnp.dot(ctx.astype(bf16), wo_ref[0], preferred_element_type=jnp.float32) + bo_ref[0]
    h1 = _layer_norm(x + attn, g1_ref[0], be1_ref[0])

    # ---- feed forward ----
    ff = jnp.dot(h1.astype(bf16), w1_ref[0], preferred_element_type=jnp.float32) + b1_ref[0]
    ff = _gelu(ff)
    ff = jnp.dot(ff.astype(bf16), w2_ref[0], preferred_element_type=jnp.float32) + b2_ref[0]

    x_new = _layer_norm(h1 + ff, g2_ref[0], be2_ref[0])
    x_ref[...] = x_new                         # carry activation to next grid step

    # ---- last layer: pooler + classifier + softmax over the BATCH axis (dim=0) ----
    @pl.when(l == pl.num_programs(0) - 1)
    def _finalize():
        cls = jnp.concatenate([x_new[b * seq:b * seq + 1, :] for b in range(batch)], axis=0)  # [B, H]
        pooled = jnp.tanh(
            jnp.dot(cls.astype(bf16), wp_ref[...], preferred_element_type=jnp.float32) + bp_ref[...])
        logits = jnp.dot(pooled.astype(bf16), wc_ref[...],
                         preferred_element_type=jnp.float32) + bc_ref[...]                    # [B, C]
        m = jnp.max(logits, axis=0, keepdims=True)
        e = jnp.exp(logits - m)
        sm = e / jnp.sum(e, axis=0, keepdims=True)                   # exact: columns sum to 1
        # lane-dense full-tile write; wrapper slices back to (B, NB_CLASS)
        top = jnp.concatenate([sm, jnp.zeros((batch, OUT_LANES - nb_class), jnp.float32)], axis=1)
        bot = jnp.zeros((OUT_ROWS - batch, OUT_LANES), jnp.float32)
        o_ref[...] = jnp.concatenate([top, bot], axis=0)


# ----------------------------- BlockSpec helpers ------------------------------
def _resident(shape):
    zeros = tuple(0 for _ in shape)
    return pl.BlockSpec(shape, lambda l: zeros)


def _per_layer(shape):
    zeros = tuple(0 for _ in shape)
    return pl.BlockSpec((1,) + shape, lambda l: (l,) + zeros)


# ----------------------------- wrapper ---------------------------------------
def ernie_classifier_forward(params, input_ids, attention_mask, token_type_ids):
    B, S = input_ids.shape
    n = B * S
    H, I = HIDDEN, INTERMEDIATE

    # Embedding gathers are glue (plain JAX); everything else is one pipelined Pallas call.
    emb = (
        params["word_emb"][input_ids]
        + params["pos_emb"][jnp.arange(S)][None, :, :]
        + params["type_emb"][token_type_ids]
    ).astype(jnp.float32)
    emb2 = emb.reshape(n, H)                                   # [B*S, H] slab
    keep = attention_mask.astype(jnp.float32).reshape(1, n)    # [1, B*S] key-keep vector

    kernel = functools.partial(
        ernie_layer_kernel,
        num_heads=NUM_HEADS, head_dim=HEAD_DIM, batch=B, seq=S, nb_class=NB_CLASS)

    in_specs = [
        _resident((n, H)),                      # emb
        _resident((1, n)),                      # keep
        _resident((1, H)), _resident((1, H)),   # emb LN gamma/beta
        _per_layer((H, H)), _per_layer((1, H)),  # wq, bq
        _per_layer((H, H)), _per_layer((1, H)),  # wk, bk
        _per_layer((H, H)), _per_layer((1, H)),  # wv, bv
        _per_layer((H, H)), _per_layer((1, H)),  # wo, bo
        _per_layer((1, H)), _per_layer((1, H)),  # g1, be1
        _per_layer((H, I)), _per_layer((1, I)),  # w1, b1
        _per_layer((I, H)), _per_layer((1, H)),  # w2, b2
        _per_layer((1, H)), _per_layer((1, H)),  # g2, be2
        _resident((H, H)), _resident((1, H)),    # pooler
        _resident((H, NB_CLASS)), _resident((1, NB_CLASS)),  # classifier
    ]

    out_padded = pl.pallas_call(
        kernel,
        out_shape=jax.ShapeDtypeStruct((OUT_ROWS, OUT_LANES), jnp.float32),
        grid_spec=pltpu.PrefetchScalarGridSpec(
            num_scalar_prefetch=0,
            grid=(NUM_LAYERS,),                  # layer axis: pipelined weight DMA
            in_specs=in_specs,
            out_specs=pl.BlockSpec((OUT_ROWS, OUT_LANES), lambda l: (0, 0)),
            scratch_shapes=[pltpu.VMEM((n, H), jnp.float32)],   # persistent activation slab
        ),
        compiler_params=pltpu.CompilerParams(
            dimension_semantics=("arbitrary",),   # activation carries across layers
            vmem_limit_bytes=32 * 1024 * 1024,    # raise further when scaling HIDDEN/INTERMEDIATE
        ),
    )(
        emb2, keep, params["emb_g"], params["emb_b"],
        params["wq"], params["bq"], params["wk"], params["bk"],
        params["wv"], params["bv"], params["wo"], params["bo"],
        params["g1"], params["be1"], params["w1"], params["b1"],
        params["w2"], params["b2"], params["g2"], params["be2"],
        params["wp"], params["bp"], params["wc"], params["bc"],
    )
    return out_padded[:B, :NB_CLASS]


# ----------------------------- parameter init --------------------------------
def init_params(key):
    def nrm(k, shape, dtype=jnp.float32, scale=0.02):
        return (scale * jax.random.normal(k, shape)).astype(dtype)

    keys = jax.random.split(key, 12)
    L, H, I = NUM_LAYERS, HIDDEN, INTERMEDIATE
    bf = jnp.bfloat16   # matmul weights stored bf16 (half the DMA / VMEM footprint)
    params = {
        "word_emb": nrm(keys[0], (VOCAB, H)),
        "pos_emb": nrm(keys[1], (MAX_POS, H)),
        "type_emb": nrm(keys[2], (TYPE_VOCAB, H)),
        "emb_g": jnp.ones((1, H), jnp.float32),
        "emb_b": jnp.zeros((1, H), jnp.float32),
        # per-layer weights stacked along a leading layer axis (indexed by the layer grid)
        "wq": nrm(keys[3], (L, H, H), bf), "bq": jnp.zeros((L, 1, H), jnp.float32),
        "wk": nrm(keys[4], (L, H, H), bf), "bk": jnp.zeros((L, 1, H), jnp.float32),
        "wv": nrm(keys[5], (L, H, H), bf), "bv": jnp.zeros((L, 1, H), jnp.float32),
        "wo": nrm(keys[6], (L, H, H), bf), "bo": jnp.zeros((L, 1, H), jnp.float32),
        "g1": jnp.ones((L, 1, H), jnp.float32), "be1": jnp.zeros((L, 1, H), jnp.float32),
        "w1": nrm(keys[7], (L, H, I), bf), "b1": jnp.zeros((L, 1, I), jnp.float32),
        "w2": nrm(keys[8], (L, I, H), bf), "b2": jnp.zeros((L, 1, H), jnp.float32),
        "g2": jnp.ones((L, 1, H), jnp.float32), "be2": jnp.zeros((L, 1, H), jnp.float32),
        # pooler + classifier
        "wp": nrm(keys[9], (H, H), bf), "bp": jnp.zeros((1, H), jnp.float32),
        "wc": nrm(keys[10], (H, NB_CLASS), bf), "bc": jnp.zeros((1, NB_CLASS), jnp.float32),
    }
    return params


# TODO(synk): tokenizer / pretrained-checkpoint loading (AutoTokenizer/AutoModel) has no
#             Pallas equivalent; weights are synthetic deterministic inits.
# TODO(synk): a second, 'parallel' grid dimension over token tiles (for v7x's 2 TensorCores)
#             needs cross-tile attention exchange; not worthwhile at this toy size.

if __name__ == "__main__":
    B, S = 2, 8
    key = jax.random.PRNGKey(0)
    k_ids, k_params = jax.random.split(key)

    input_ids = jax.random.randint(k_ids, (B, S), 0, VOCAB, dtype=jnp.int32)
    attention_mask = jnp.ones((B, S), jnp.int32).at[1, 6:].set(0)   # pad last 2 tokens of ex 1
    token_type_ids = jnp.zeros((B, S), jnp.int32)

    params = init_params(k_params)

    fwd = jax.jit(ernie_classifier_forward)
    out = fwd(params, input_ids, attention_mask, token_type_ids)
    out = jax.block_until_ready(out)

    assert out.shape == (B, NB_CLASS)
    # softmax over dim=0 => each class column sums to 1 across the batch
    assert jnp.allclose(jnp.sum(out, axis=0), 1.0, atol=1e-5)
    print("KERNEL_OK")
</pallas_src>

<mosaic_0001>
module attributes {stable_mosaic.version = 11 : i64} {
  func.func @ernie_layer_kernel(%arg0: i32, %arg1: memref<16x32xf32, #tpu.memory_space<vmem>>, %arg2: memref<1x16xf32, #tpu.memory_space<vmem>>, %arg3: memref<1x32xf32, #tpu.memory_space<vmem>>, %arg4: memref<1x32xf32, #tpu.memory_space<vmem>>, %arg5: memref<1x32x32xbf16, #tpu.memory_space<vmem>>, %arg6: memref<1x1x32xf32, #tpu.memory_space<vmem>>, %arg7: memref<1x32x32xbf16, #tpu.memory_space<vmem>>, %arg8: memref<1x1x32xf32, #tpu.memory_space<vmem>>, %arg9: memref<1x32x32xbf16, #tpu.memory_space<vmem>>, %arg10: memref<1x1x32xf32, #tpu.memory_space<vmem>>, %arg11: memref<1x32x32xbf16, #tpu.memory_space<vmem>>, %arg12: memref<1x1x32xf32, #tpu.memory_space<vmem>>, %arg13: memref<1x1x32xf32, #tpu.memory_space<vmem>>, %arg14: memref<1x1x32xf32, #tpu.memory_space<vmem>>, %arg15: memref<1x32x64xbf16, #tpu.memory_space<vmem>>, %arg16: memref<1x1x64xf32, #tpu.memory_space<vmem>>, %arg17: memref<1x64x32xbf16, #tpu.memory_space<vmem>>, %arg18: memref<1x1x32xf32, #tpu.memory_space<vmem>>, %arg19: memref<1x1x32xf32, #tpu.memory_space<vmem>>, %arg20: memref<1x1x32xf32, #tpu.memory_space<vmem>>, %arg21: memref<32x32xbf16, #tpu.memory_space<vmem>>, %arg22: memref<1x32xf32, #tpu.memory_space<vmem>>, %arg23: memref<32x1xbf16, #tpu.memory_space<vmem>>, %arg24: memref<1x1xf32, #tpu.memory_space<vmem>>, %arg25: memref<8x128xf32, #tpu.memory_space<vmem>>, %arg26: memref<16x32xf32, #tpu.memory_space<vmem>>) attributes {dimension_semantics = [#tpu.dimension_semantics<arbitrary>], iteration_bounds = array<i64: 2>, scalar_prefetch = 0 : i64, scratch_operands = 1 : i64, tpu.core_type = #tpu.core_type<tc>, window_params = [{pipeline_mode = #tpu.pipeline_mode<synchronous>, transform_indices = @transform_0, window_bounds = array<i64: 16, 32>}, {pipeline_mode = #tpu.pipeline_mode<synchronous>, transform_indices = @transform_1, window_bounds = array<i64: 1, 16>}, {pipeline_mode = #tpu.pipeline_mode<synchronous>, transform_indices = @transform_2, window_bounds = array<i64: 1, 32>}, {pipeline_mode = #tpu.pipeline_mode<synchronous>, transform_indices = @transform_3, window_bounds = array<i64: 1, 32>}, {transform_indices = @transform_4, window_bounds = array<i64: 1, 32, 32>}, {transform_indices = @transform_5, window_bounds = array<i64: 1, 1, 32>}, {transform_indices = @transform_6, window_bounds = array<i64: 1, 32, 32>}, {transform_indices = @transform_7, window_bounds = array<i64: 1, 1, 32>}, {transform_indices = @transform_8, window_bounds = array<i64: 1, 32, 32>}, {transform_indices = @transform_9, window_bounds = array<i64: 1, 1, 32>}, {transform_indices = @transform_10, window_bounds = array<i64: 1, 32, 32>}, {transform_indices = @transform_11, window_bounds = array<i64: 1, 1, 32>}, {transform_indices = @transform_12, window_bounds = array<i64: 1, 1, 32>}, {transform_indices = @transform_13, window_bounds = array<i64: 1, 1, 32>}, {transform_indices = @transform_14, window_bounds = array<i64: 1, 32, 64>}, {transform_indices = @transform_15, window_bounds = array<i64: 1, 1, 64>}, {transform_indices = @transform_16, window_bounds = array<i64: 1, 64, 32>}, {transform_indices = @transform_17, window_bounds = array<i64: 1, 1, 32>}, {transform_indices = @transform_18, window_bounds = array<i64: 1, 1, 32>}, {transform_indices = @transform_19, window_bounds = array<i64: 1, 1, 32>}, {pipeline_mode = #tpu.pipeline_mode<synchronous>, transform_indices = @transform_20, window_bounds = array<i64: 32, 32>}, {pipeline_mode = #tpu.pipeline_mode<synchronous>, transform_indices = @transform_21, window_bounds = array<i64: 1, 32>}, {pipeline_mode = #tpu.pipeline_mode<synchronous>, transform_indices = @transform_22, window_bounds = array<i64: 32, 1>}, {pipeline_mode = #tpu.pipeline_mode<synchronous>, transform_indices = @transform_23, window_bounds = array<i64: 1, 1>}, {pipeline_mode = #tpu.pipeline_mode<synchronous>, transform_indices = @transform_24, window_bounds = array<i64: 8, 128>}]} {
    %c0_i32 = arith.constant 0 : i32
    %0 = arith.cmpi eq, %arg0, %c0_i32 : i32
    %1 = arith.extui %0 : i1 to i32
    %c0_i32_0 = arith.constant 0 : i32
    %2 = arith.cmpi ne, %1, %c0_i32_0 : i32
    scf.if %2 {
      %c0_85 = arith.constant 0 : index
      %c0_86 = arith.constant 0 : index
      %201 = vector.load %arg1[%c0_85, %c0_86] : memref<16x32xf32, #tpu.memory_space<vmem>>, vector<16x32xf32>
      %c0_87 = arith.constant 0 : index
      %c0_88 = arith.constant 0 : index
      %202 = vector.load %arg3[%c0_87, %c0_88] : memref<1x32xf32, #tpu.memory_space<vmem>>, vector<1x32xf32>
      %c0_89 = arith.constant 0 : index
      %c0_90 = arith.constant 0 : index
      %203 = vector.load %arg4[%c0_89, %c0_90] : memref<1x32xf32, #tpu.memory_space<vmem>>, vector<1x32xf32>
      %cst_91 = arith.constant dense<0.000000e+00> : vector<16xf32>
      %204 = vector.multi_reduction <add>, %201, %cst_91 [1] : vector<16x32xf32> to vector<16xf32>
      %205 = vector.shape_cast %204 : vector<16xf32> to vector<16x1xf32>
      %cst_92 = arith.constant 3.200000e+01 : f32
      %206 = vector.broadcast %cst_92 : f32 to vector<16x1xf32>
      %207 = arith.divf %205, %206 : vector<16x1xf32>
      %208 = vector.broadcast %207 : vector<16x1xf32> to vector<16x32xf32>
      %209 = arith.subf %201, %208 : vector<16x32xf32>
      %210 = vector.broadcast %207 : vector<16x1xf32> to vector<16x32xf32>
      %211 = arith.subf %201, %210 : vector<16x32xf32>
      %212 = arith.mulf %209, %211 : vector<16x32xf32>
      %cst_93 = arith.constant dense<0.000000e+00> : vector<16xf32>
      %213 = vector.multi_reduction <add>, %212, %cst_93 [1] : vector<16x32xf32> to vector<16xf32>
      %214 = vector.shape_cast %213 : vector<16xf32> to vector<16x1xf32>
      %cst_94 = arith.constant 3.200000e+01 : f32
      %215 = vector.broadcast %cst_94 : f32 to vector<16x1xf32>
      %216 = arith.divf %214, %215 : vector<16x1xf32>
      %217 = vector.broadcast %207 : vector<16x1xf32> to vector<16x32xf32>
      %218 = arith.subf %201, %217 : vector<16x32xf32>
      %cst_95 = arith.constant 9.99999996E-13 : f32
      %219 = vector.broadcast %cst_95 : f32 to vector<16x1xf32>
      %220 = arith.addf %216, %219 : vector<16x1xf32>
      %221 = math.rsqrt %220 : vector<16x1xf32>
      %222 = vector.broadcast %221 : vector<16x1xf32> to vector<16x32xf32>
      %223 = arith.mulf %218, %222 : vector<16x32xf32>
      %224 = vector.broadcast %202 : vector<1x32xf32> to vector<16x32xf32>
      %225 = arith.mulf %223, %224 : vector<16x32xf32>
      %226 = vector.broadcast %203 : vector<1x32xf32> to vector<16x32xf32>
      %227 = arith.addf %225, %226 : vector<16x32xf32>
      %c0_96 = arith.constant 0 : index
      %c0_97 = arith.constant 0 : index
      %228 = vector.load %arg26[%c0_96, %c0_97] : memref<16x32xf32, #tpu.memory_space<vmem>>, vector<16x32xf32>
      tpu.vector_store %arg26[%c0_96, %c0_97], %227 {strides = array<i32>} : memref<16x32xf32, #tpu.memory_space<vmem>>, vector<16x32xf32>,
      %cst_98 = arith.constant 0.000000e+00 : f32
      %229 = vector.broadcast %cst_98 : f32 to vector<8x128xf32>
      %c0_99 = arith.constant 0 : index
      %c0_100 = arith.constant 0 : index
      %230 = vector.load %arg25[%c0_99, %c0_100] : memref<8x128xf32, #tpu.memory_space<vmem>>, vector<8x128xf32>
      tpu.vector_store %arg25[%c0_99, %c0_100], %229 {strides = array<i32>} : memref<8x128xf32, #tpu.memory_space<vmem>>, vector<8x128xf32>,
    } else {
    }
    %c0 = arith.constant 0 : index
    %c0_1 = arith.constant 0 : index
    %3 = vector.load %arg26[%c0, %c0_1] : memref<16x32xf32, #tpu.memory_space<vmem>>, vector<16x32xf32>
    %4 = arith.truncf %3 : vector<16x32xf32> to vector<16x32xbf16>
    %c0_2 = arith.constant 0 : index
    %c0_3 = arith.constant 0 : index
    %c0_4 = arith.constant 0 : index
    %5 = vector.load %arg5[%c0_2, %c0_3, %c0_4] : memref<1x32x32xbf16, #tpu.memory_space<vmem>>, vector<1x32x32xbf16>
    %6 = vector.shape_cast %5 : vector<1x32x32xbf16> to vector<32x32xbf16>
    %cst = arith.constant dense<0.000000e+00> : vector<16x32xf32>
    %7 = tpu.matmul %4, %6, %cst {dimension_numbers = #tpu.dot_dimension_numbers<[1], [0], [0], [1], [0, 0, 1, 1], [], []>} : vector<16x32xbf16>, vector<32x32xbf16>, vector<16x32xf32> -> vector<16x32xf32>
    %c0_5 = arith.constant 0 : index
    %c0_6 = arith.constant 0 : index
    %c0_7 = arith.constant 0 : index
    %8 = vector.load %arg6[%c0_5, %c0_6, %c0_7] : memref<1x1x32xf32, #tpu.memory_space<vmem>>, vector<1x1x32xf32>
    %9 = vector.shape_cast %8 : vector<1x1x32xf32> to vector<1x32xf32>
    %10 = vector.broadcast %9 : vector<1x32xf32> to vector<16x32xf32>
    %11 = arith.addf %7, %10 : vector<16x32xf32>
    %c0_8 = arith.constant 0 : index
    %c0_9 = arith.constant 0 : index
    %c0_10 = arith.constant 0 : index
    %12 = vector.load %arg7[%c0_8, %c0_9, %c0_10] : memref<1x32x32xbf16, #tpu.memory_space<vmem>>, vector<1x32x32xbf16>
    %13 = vector.shape_cast %12 : vector<1x32x32xbf16> to vector<32x32xbf16>
    %cst_11 = arith.constant dense<0.000000e+00> : vector<16x32xf32>
    %14 = tpu.matmul %4, %13, %cst_11 {dimension_numbers = #tpu.dot_dimension_numbers<[1], [0], [0], [1], [0, 0, 1, 1], [], []>} : vector<16x32xbf16>, vector<32x32xbf16>, vector<16x32xf32> -> vector<16x32xf32>
    %c0_12 = arith.constant 0 : index
    %c0_13 = arith.constant 0 : index
    %c0_14 = arith.constant 0 : index
    %15 = vector.load %arg8[%c0_12, %c0_13, %c0_14] : memref<1x1x32xf32, #tpu.memory_space<vmem>>, vector<1x1x32xf32>
    %16 = vector.shape_cast %15 : vector<1x1x32xf32> to vector<1x32xf32>
    %17 = vector.broadcast %16 : vector<1x32xf32> to vector<16x32xf32>
    %18 = arith.addf %14, %17 : vector<16x32xf32>
    %c0_15 = arith.constant 0 : index
    %c0_16 = arith.constant 0 : index
    %c0_17 = arith.constant 0 : index
    %19 = vector.load %arg9[%c0_15, %c0_16, %c0_17] : memref<1x32x32xbf16, #tpu.memory_space<vmem>>, vector<1x32x32xbf16>
    %20 = vector.shape_cast %19 : vector<1x32x32xbf16> to vector<32x32xbf16>
    %cst_18 = arith.constant dense<0.000000e+00> : vector<16x32xf32>
    %21 = tpu.matmul %4, %20, %cst_18 {dimension_numbers = #tpu.dot_dimension_numbers<[1], [0], [0], [1], [0, 0, 1, 1], [], []>} : vector<16x32xbf16>, vector<32x32xbf16>, vector<16x32xf32> -> vector<16x32xf32>
    %c0_19 = arith.constant 0 : index
    %c0_20 = arith.constant 0 : index
    %c0_21 = arith.constant 0 : index
    %22 = vector.load %arg10[%c0_19, %c0_20, %c0_21] : memref<1x1x32xf32, #tpu.memory_space<vmem>>, vector<1x1x32xf32>
    %23 = vector.shape_cast %22 : vector<1x1x32xf32> to vector<1x32xf32>
    %24 = vector.broadcast %23 : vector<1x32xf32> to vector<16x32xf32>
    %25 = arith.addf %21, %24 : vector<16x32xf32>
    %cst_22 = arith.constant 2.500000e-01 : f32
    %26 = vector.broadcast %cst_22 : f32 to vector<16x32xf32>
    %27 = arith.mulf %11, %26 : vector<16x32xf32>
    %28 = vector.extract_strided_slice %27 {offsets = [0, 0], sizes = [16, 16], strides = [1, 1]} : vector<16x32xf32> to vector<16x16xf32>
    %29 = vector.extract_strided_slice %27 {offsets = [0, 16], sizes = [16, 16], strides = [1, 1]} : vector<16x32xf32> to vector<16x16xf32>
    %30 = vector.shape_cast %28 : vector<16x16xf32> to vector<1x16x16xf32>
    %31 = vector.shape_cast %29 : vector<16x16xf32> to vector<1x16x16xf32>
    %32 = tpu.concatenate %30, %31 in 0 : vector<1x16x16xf32>, vector<1x16x16xf32> -> vector<2x16x16xf32>
    %33 = arith.truncf %32 : vector<2x16x16xf32> to vector<2x16x16xbf16>
    %34 = vector.extract_strided_slice %18 {offsets = [0, 0], sizes = [16, 16], strides = [1, 1]} : vector<16x32xf32> to vector<16x16xf32>
    %35 = vector.extract_strided_slice %18 {offsets = [0, 16], sizes = [16, 16], strides = [1, 1]} : vector<16x32xf32> to vector<16x16xf32>
    %36 = vector.shape_cast %34 : vector<16x16xf32> to vector<1x16x16xf32>
    %37 = vector.shape_cast %35 : vector<16x16xf32> to vector<1x16x16xf32>
    %38 = tpu.concatenate %36, %37 in 0 : vector<1x16x16xf32>, vector<1x16x16xf32> -> vector<2x16x16xf32>
    %39 = arith.truncf %38 : vector<2x16x16xf32> to vector<2x16x16xbf16>
    %40 = vector.extract_strided_slice %25 {offsets = [0, 0], sizes = [16, 16], strides = [1, 1]} : vector<16x32xf32> to vector<16x16xf32>
    %41 = vector.extract_strided_slice %25 {offsets = [0, 16], sizes = [16, 16], strides = [1, 1]} : vector<16x32xf32> to vector<16x16xf32>
    %42 = vector.shape_cast %40 : vector<16x16xf32> to vector<1x16x16xf32>
    %43 = vector.shape_cast %41 : vector<16x16xf32> to vector<1x16x16xf32>
    %44 = tpu.concatenate %42, %43 in 0 : vector<1x16x16xf32>, vector<1x16x16xf32> -> vector<2x16x16xf32>
    %45 = arith.truncf %44 : vector<2x16x16xf32> to vector<2x16x16xbf16>
    %c0_23 = arith.constant 0 : index
    %c0_24 = arith.constant 0 : index
    %46 = vector.load %arg2[%c0_23, %c0_24] : memref<1x16xf32, #tpu.memory_space<vmem>>, vector<1x16xf32>
    %cst_25 = arith.constant 1.000000e+00 : f32
    %47 = vector.broadcast %cst_25 : f32 to vector<1x16xf32>
    %48 = arith.subf %46, %47 : vector<1x16xf32>
    %cst_26 = arith.constant 1.000000e+09 : f32
    %49 = vector.broadcast %cst_26 : f32 to vector<1x16xf32>
    %50 = arith.mulf %48, %49 : vector<1x16xf32>
    %51 = vector.extract_strided_slice %33 {offsets = [0, 0, 0], sizes = [2, 8, 16], strides = [1, 1, 1]} : vector<2x16x16xbf16> to vector<2x8x16xbf16>
    %52 = vector.extract_strided_slice %39 {offsets = [0, 0, 0], sizes = [2, 8, 16], strides = [1, 1, 1]} : vector<2x16x16xbf16> to vector<2x8x16xbf16>
    %53 = vector.extract_strided_slice %45 {offsets = [0, 0, 0], sizes = [2, 8, 16], strides = [1, 1, 1]} : vector<2x16x16xbf16> to vector<2x8x16xbf16>
    "tpu.trace_start"() <{level = 10 : i32, message = "hqd,hkd->hqk"}> : () -> ()
    %cst_27 = arith.constant dense<0.000000e+00> : vector<2x8x8xf32>
    %54 = tpu.matmul %51, %52, %cst_27 {dimension_numbers = #tpu.dot_dimension_numbers<[2], [2], [1], [1], [0, 0, 0, 1, 1, 1], [0], [0]>} : vector<2x8x16xbf16>, vector<2x8x16xbf16>, vector<2x8x8xf32> -> vector<2x8x8xf32>
    "tpu.trace_stop"() : () -> ()
    %55 = vector.extract_strided_slice %50 {offsets = [0, 0], sizes = [1, 8], strides = [1, 1]} : vector<1x16xf32> to vector<1x8xf32>
    %56 = vector.shape_cast %55 : vector<1x8xf32> to vector<1x1x8xf32>
    %57 = vector.broadcast %56 : vector<1x1x8xf32> to vector<2x8x8xf32>
    %58 = arith.addf %54, %57 : vector<2x8x8xf32>
    %cst_28 = arith.constant dense<0xFF800000> : vector<2x8xf32>
    %59 = vector.multi_reduction <maximumf>, %58, %cst_28 [2] : vector<2x8x8xf32> to vector<2x8xf32>
    %60 = vector.shape_cast %59 : vector<2x8xf32> to vector<2x8x1xf32>
    %61 = vector.broadcast %60 : vector<2x8x1xf32> to vector<2x8x8xf32>
    %62 = arith.subf %58, %61 : vector<2x8x8xf32>
    %63 = math.exp %62 : vector<2x8x8xf32>
    %cst_29 = arith.constant dense<0.000000e+00> : vector<2x8xf32>
    %64 = vector.multi_reduction <add>, %63, %cst_29 [2] : vector<2x8x8xf32> to vector<2x8xf32>
    %65 = vector.shape_cast %64 : vector<2x8xf32> to vector<2x8x1xf32>
    %66 = tpu.reciprocal %65 {approx = true} : vector<2x8x1xf32> -> vector<2x8x1xf32>
    %67 = vector.broadcast %66 : vector<2x8x1xf32> to vector<2x8x8xf32>
    %68 = arith.mulf %63, %67 : vector<2x8x8xf32>
    %69 = arith.truncf %68 : vector<2x8x8xf32> to vector<2x8x8xbf16>
    "tpu.trace_start"() <{level = 10 : i32, message = "hqk,hkd->hqd"}> : () -> ()
    %cst_30 = arith.constant dense<0.000000e+00> : vector<2x8x16xf32>
    %70 = tpu.matmul %69, %53, %cst_30 {dimension_numbers = #tpu.dot_dimension_numbers<[2], [1], [1], [2], [0, 0, 0, 1, 1, 2], [0], [0]>} : vector<2x8x8xbf16>, vector<2x8x16xbf16>, vector<2x8x16xf32> -> vector<2x8x16xf32>
    "tpu.trace_stop"() : () -> ()
    %71 = vector.extract_strided_slice %70 {offsets = [0, 0, 0], sizes = [1, 8, 16], strides = [1, 1, 1]} : vector<2x8x16xf32> to vector<1x8x16xf32>
    %72 = vector.shape_cast %71 : vector<1x8x16xf32> to vector<8x16xf32>
    %73 = vector.extract_strided_slice %70 {offsets = [1, 0, 0], sizes = [1, 8, 16], strides = [1, 1, 1]} : vector<2x8x16xf32> to vector<1x8x16xf32>
    %74 = vector.shape_cast %73 : vector<1x8x16xf32> to vector<8x16xf32>
    %75 = tpu.concatenate %72, %74 in 1 : vector<8x16xf32>, vector<8x16xf32> -> vector<8x32xf32>
    %76 = vector.extract_strided_slice %33 {offsets = [0, 8, 0], sizes = [2, 8, 16], strides = [1, 1, 1]} : vector<2x16x16xbf16> to vector<2x8x16xbf16>
    %77 = vector.extract_strided_slice %39 {offsets = [0, 8, 0], sizes = [2, 8, 16], strides = [1, 1, 1]} : vector<2x16x16xbf16> to vector<2x8x16xbf16>
    %78 = vector.extract_strided_slice %45 {offsets = [0, 8, 0], sizes = [2, 8, 16], strides = [1, 1, 1]} : vector<2x16x16xbf16> to vector<2x8x16xbf16>
    "tpu.trace_start"() <{level = 10 : i32, message = "hqd,hkd->hqk"}> : () -> ()
    %cst_31 = arith.constant dense<0.000000e+00> : vector<2x8x8xf32>
    %79 = tpu.matmul %76, %77, %cst_31 {dimension_numbers = #tpu.dot_dimension_numbers<[2], [2], [1], [1], [0, 0, 0, 1, 1, 1], [0], [0]>} : vector<2x8x16xbf16>, vector<2x8x16xbf16>, vector<2x8x8xf32> -> vector<2x8x8xf32>
    "tpu.trace_stop"() : () -> ()
    %80 = vector.extract_strided_slice %50 {offsets = [0, 8], sizes = [1, 8], strides = [1, 1]} : vector<1x16xf32> to vector<1x8xf32>
    %81 = vector.shape_cast %80 : vector<1x8xf32> to vector<1x1x8xf32>
    %82 = vector.broadcast %81 : vector<1x1x8xf32> to vector<2x8x8xf32>
    %83 = arith.addf %79, %82 : vector<2x8x8xf32>
    %cst_32 = arith.constant dense<0xFF800000> : vector<2x8xf32>
    %84 = vector.multi_reduction <maximumf>, %83, %cst_32 [2] : vector<2x8x8xf32> to vector<2x8xf32>
    %85 = vector.shape_cast %84 : vector<2x8xf32> to vector<2x8x1xf32>
    %86 = vector.broadcast %85 : vector<2x8x1xf32> to vector<2x8x8xf32>
    %87 = arith.subf %83, %86 : vector<2x8x8xf32>
    %88 = math.exp %87 : vector<2x8x8xf32>
    %cst_33 = arith.constant dense<0.000000e+00> : vector<2x8xf32>
    %89 = vector.multi_reduction <add>, %88, %cst_33 [2] : vector<2x8x8xf32> to vector<2x8xf32>
    %90 = vector.shape_cast %89 : vector<2x8xf32> to vector<2x8x1xf32>
    %91 = tpu.reciprocal %90 {approx = true} : vector<2x8x1xf32> -> vector<2x8x1xf32>
    %92 = vector.broadcast %91 : vector<2x8x1xf32> to vector<2x8x8xf32>
    %93 = arith.mulf %88, %92 : vector<2x8x8xf32>
    %94 = arith.truncf %93 : vector<2x8x8xf32> to vector<2x8x8xbf16>
    "tpu.trace_start"() <{level = 10 : i32, message = "hqk,hkd->hqd"}> : () -> ()
    %cst_34 = arith.constant dense<0.000000e+00> : vector<2x8x16xf32>
    %95 = tpu.matmul %94, %78, %cst_34 {dimension_numbers = #tpu.dot_dimension_numbers<[2], [1], [1], [2], [0, 0, 0, 1, 1, 2], [0], [0]>} : vector<2x8x8xbf16>, vector<2x8x16xbf16>, vector<2x8x16xf32> -> vector<2x8x16xf32>
    "tpu.trace_stop"() : () -> ()
    %96 = vector.extract_strided_slice %95 {offsets = [0, 0, 0], sizes = [1, 8, 16], strides = [1, 1, 1]} : vector<2x8x16xf32> to vector<1x8x16xf32>
    %97 = vector.shape_cast %96 : vector<1x8x16xf32> to vector<8x16xf32>
    %98 = vector.extract_strided_slice %95 {offsets = [1, 0, 0], sizes = [1, 8, 16], strides = [1, 1, 1]} : vector<2x8x16xf32> to vector<1x8x16xf32>
    %99 = vector.shape_cast %98 : vector<1x8x16xf32> to vector<8x16xf32>
    %100 = tpu.concatenate %97, %99 in 1 : vector<8x16xf32>, vector<8x16xf32> -> vector<8x32xf32>
    %101 = tpu.concatenate %75, %100 in 0 : vector<8x32xf32>, vector<8x32xf32> -> vector<16x32xf32>
    %102 = arith.truncf %101 : vector<16x32xf32> to vector<16x32xbf16>
    %c0_35 = arith.constant 0 : index
    %c0_36 = arith.constant 0 : index
    %c0_37 = arith.constant 0 : index
    %103 = vector.load %arg11[%c0_35, %c0_36, %c0_37] : memref<1x32x32xbf16, #tpu.memory_space<vmem>>, vector<1x32x32xbf16>
    %104 = vector.shape_cast %103 : vector<1x32x32xbf16> to vector<32x32xbf16>
    %cst_38 = arith.constant dense<0.000000e+00> : vector<16x32xf32>
    %105 = tpu.matmul %102, %104, %cst_38 {dimension_numbers = #tpu.dot_dimension_numbers<[1], [0], [0], [1], [0, 0, 1, 1], [], []>} : vector<16x32xbf16>, vector<32x32xbf16>, vector<16x32xf32> -> vector<16x32xf32>
    %c0_39 = arith.constant 0 : index
    %c0_40 = arith.constant 0 : index
    %c0_41 = arith.constant 0 : index
    %106 = vector.load %arg12[%c0_39, %c0_40, %c0_41] : memref<1x1x32xf32, #tpu.memory_space<vmem>>, vector<1x1x32xf32>
    %107 = vector.shape_cast %106 : vector<1x1x32xf32> to vector<1x32xf32>
    %108 = vector.broadcast %107 : vector<1x32xf32> to vector<16x32xf32>
    %109 = arith.addf %105, %108 : vector<16x32xf32>
    %110 = arith.addf %3, %109 : vector<16x32xf32>
    %c0_42 = arith.constant 0 : index
    %c0_43 = arith.constant 0 : index
    %c0_44 = arith.constant 0 : index
    %111 = vector.load %arg13[%c0_42, %c0_43, %c0_44] : memref<1x1x32xf32, #tpu.memory_space<vmem>>, vector<1x1x32xf32>
    %112 = vector.shape_cast %111 : vector<1x1x32xf32> to vector<1x32xf32>
    %c0_45 = arith.constant 0 : index
    %c0_46 = arith.constant 0 : index
    %c0_47 = arith.constant 0 : index
    %113 = vector.load %arg14[%c0_45, %c0_46, %c0_47] : memref<1x1x32xf32, #tpu.memory_space<vmem>>, vector<1x1x32xf32>
    %114 = vector.shape_cast %113 : vector<1x1x32xf32> to vector<1x32xf32>
    %cst_48 = arith.constant dense<0.000000e+00> : vector<16xf32>
    %115 = vector.multi_reduction <add>, %110, %cst_48 [1] : vector<16x32xf32> to vector<16xf32>
    %116 = vector.shape_cast %115 : vector<16xf32> to vector<16x1xf32>
    %cst_49 = arith.constant 3.200000e+01 : f32
    %117 = vector.broadcast %cst_49 : f32 to vector<16x1xf32>
    %118 = arith.divf %116, %117 : vector<16x1xf32>
    %119 = vector.broadcast %118 : vector<16x1xf32> to vector<16x32xf32>
    %120 = arith.subf %110, %119 : vector<16x32xf32>
    %121 = vector.broadcast %118 : vector<16x1xf32> to vector<16x32xf32>
    %122 = arith.subf %110, %121 : vector<16x32xf32>
    %123 = arith.mulf %120, %122 : vector<16x32xf32>
    %cst_50 = arith.constant dense<0.000000e+00> : vector<16xf32>
    %124 = vector.multi_reduction <add>, %123, %cst_50 [1] : vector<16x32xf32> to vector<16xf32>
    %125 = vector.shape_cast %124 : vector<16xf32> to vector<16x1xf32>
    %cst_51 = arith.constant 3.200000e+01 : f32
    %126 = vector.broadcast %cst_51 : f32 to vector<16x1xf32>
    %127 = arith.divf %125, %126 : vector<16x1xf32>
    %128 = vector.broadcast %118 : vector<16x1xf32> to vector<16x32xf32>
    %129 = arith.subf %110, %128 : vector<16x32xf32>
    %cst_52 = arith.constant 9.99999996E-13 : f32
    %130 = vector.broadcast %cst_52 : f32 to vector<16x1xf32>
    %131 = arith.addf %127, %130 : vector<16x1xf32>
    %132 = math.rsqrt %131 : vector<16x1xf32>
    %133 = vector.broadcast %132 : vector<16x1xf32> to vector<16x32xf32>
    %134 = arith.mulf %129, %133 : vector<16x32xf32>
    %135 = vector.broadcast %112 : vector<1x32xf32> to vector<16x32xf32>
    %136 = arith.mulf %134, %135 : vector<16x32xf32>
    %137 = vector.broadcast %114 : vector<1x32xf32> to vector<16x32xf32>
    %138 = arith.addf %136, %137 : vector<16x32xf32>
    %139 = arith.truncf %138 : vector<16x32xf32> to vector<16x32xbf16>
    %c0_53 = arith.constant 0 : index
    %c0_54 = arith.constant 0 : index
    %c0_55 = arith.constant 0 : index
    %140 = vector.load %arg15[%c0_53, %c0_54, %c0_55] : memref<1x32x64xbf16, #tpu.memory_space<vmem>>, vector<1x32x64xbf16>
    %141 = vector.shape_cast %140 : vector<1x32x64xbf16> to vector<32x64xbf16>
    %cst_56 = arith.constant dense<0.000000e+00> : vector<16x64xf32>
    %142 = tpu.matmul %139, %141, %cst_56 {dimension_numbers = #tpu.dot_dimension_numbers<[1], [0], [0], [1], [0, 0, 1, 1], [], []>} : vector<16x32xbf16>, vector<32x64xbf16>, vector<16x64xf32> -> vector<16x64xf32>
    %c0_57 = arith.constant 0 : index
    %c0_58 = arith.constant 0 : index
    %c0_59 = arith.constant 0 : index
    %143 = vector.load %arg16[%c0_57, %c0_58, %c0_59] : memref<1x1x64xf32, #tpu.memory_space<vmem>>, vector<1x1x64xf32>
    %144 = vector.shape_cast %143 : vector<1x1x64xf32> to vector<1x64xf32>
    %145 = vector.broadcast %144 : vector<1x64xf32> to vector<16x64xf32>
    %146 = arith.addf %142, %145 : vector<16x64xf32>
    %cst_60 = arith.constant 5.000000e-01 : f32
    %147 = vector.broadcast %cst_60 : f32 to vector<16x64xf32>
    %148 = arith.mulf %147, %146 : vector<16x64xf32>
    %cst_61 = arith.constant 4.471500e-02 : f32
    %149 = vector.broadcast %cst_61 : f32 to vector<16x64xf32>
    %150 = arith.mulf %149, %146 : vector<16x64xf32>
    %151 = arith.mulf %150, %146 : vector<16x64xf32>
    %152 = arith.mulf %151, %146 : vector<16x64xf32>
    %153 = arith.addf %146, %152 : vector<16x64xf32>
    %cst_62 = arith.constant 0.797884583 : f32
    %154 = vector.broadcast %cst_62 : f32 to vector<16x64xf32>
    %155 = arith.mulf %154, %153 : vector<16x64xf32>
    %156 = math.tanh %155 : vector<16x64xf32>
    %cst_63 = arith.constant 1.000000e+00 : f32
    %157 = vector.broadcast %cst_63 : f32 to vector<16x64xf32>
    %158 = arith.addf %157, %156 : vector<16x64xf32>
    %159 = arith.mulf %148, %158 : vector<16x64xf32>
    %160 = arith.truncf %159 : vector<16x64xf32> to vector<16x64xbf16>
    %c0_64 = arith.constant 0 : index
    %c0_65 = arith.constant 0 : index
    %c0_66 = arith.constant 0 : index
    %161 = vector.load %arg17[%c0_64, %c0_65, %c0_66] : memref<1x64x32xbf16, #tpu.memory_space<vmem>>, vector<1x64x32xbf16>
    %162 = vector.shape_cast %161 : vector<1x64x32xbf16> to vector<64x32xbf16>
    %cst_67 = arith.constant dense<0.000000e+00> : vector<16x32xf32>
    %163 = tpu.matmul %160, %162, %cst_67 {dimension_numbers = #tpu.dot_dimension_numbers<[1], [0], [0], [1], [0, 0, 1, 1], [], []>} : vector<16x64xbf16>, vector<64x32xbf16>, vector<16x32xf32> -> vector<16x32xf32>
    %c0_68 = arith.constant 0 : index
    %c0_69 = arith.constant 0 : index
    %c0_70 = arith.constant 0 : index
    %164 = vector.load %arg18[%c0_68, %c0_69, %c0_70] : memref<1x1x32xf32, #tpu.memory_space<vmem>>, vector<1x1x32xf32>
    %165 = vector.shape_cast %164 : vector<1x1x32xf32> to vector<1x32xf32>
    %166 = vector.broadcast %165 : vector<1x32xf32> to vector<16x32xf32>
    %167 = arith.addf %163, %166 : vector<16x32xf32>
    %168 = arith.addf %138, %167 : vector<16x32xf32>
    %c0_71 = arith.constant 0 : index
    %c0_72 = arith.constant 0 : index
    %c0_73 = arith.constant 0 : index
    %169 = vector.load %arg19[%c0_71, %c0_72, %c0_73] : memref<1x1x32xf32, #tpu.memory_space<vmem>>, vector<1x1x32xf32>
    %170 = vector.shape_cast %169 : vector<1x1x32xf32> to vector<1x32xf32>
    %c0_74 = arith.constant 0 : index
    %c0_75 = arith.constant 0 : index
    %c0_76 = arith.constant 0 : index
    %171 = vector.load %arg20[%c0_74, %c0_75, %c0_76] : memref<1x1x32xf32, #tpu.memory_space<vmem>>, vector<1x1x32xf32>
    %172 = vector.shape_cast %171 : vector<1x1x32xf32> to vector<1x32xf32>
    %cst_77 = arith.constant dense<0.000000e+00> : vector<16xf32>
    %173 = vector.multi_reduction <add>, %168, %cst_77 [1] : vector<16x32xf32> to vector<16xf32>
    %174 = vector.shape_cast %173 : vector<16xf32> to vector<16x1xf32>
    %cst_78 = arith.constant 3.200000e+01 : f32
    %175 = vector.broadcast %cst_78 : f32 to vector<16x1xf32>
    %176 = arith.divf %174, %175 : vector<16x1xf32>
    %177 = vector.broadcast %176 : vector<16x1xf32> to vector<16x32xf32>
    %178 = arith.subf %168, %177 : vector<16x32xf32>
    %179 = vector.broadcast %176 : vector<16x1xf32> to vector<16x32xf32>
    %180 = arith.subf %168, %179 : vector<16x32xf32>
    %181 = arith.mulf %178, %180 : vector<16x32xf32>
    %cst_79 = arith.constant dense<0.000000e+00> : vector<16xf32>
    %182 = vector.multi_reduction <add>, %181, %cst_79 [1] : vector<16x32xf32> to vector<16xf32>
    %183 = vector.shape_cast %182 : vector<16xf32> to vector<16x1xf32>
    %cst_80 = arith.constant 3.200000e+01 : f32
    %184 = vector.broadcast %cst_80 : f32 to vector<16x1xf32>
    %185 = arith.divf %183, %184 : vector<16x1xf32>
    %186 = vector.broadcast %176 : vector<16x1xf32> to vector<16x32xf32>
    %187 = arith.subf %168, %186 : vector<16x32xf32>
    %cst_81 = arith.constant 9.99999996E-13 : f32
    %188 = vector.broadcast %cst_81 : f32 to vector<16x1xf32>
    %189 = arith.addf %185, %188 : vector<16x1xf32>
    %190 = math.rsqrt %189 : vector<16x1xf32>
    %191 = vector.broadcast %190 : vector<16x1xf32> to vector<16x32xf32>
    %192 = arith.mulf %187, %191 : vector<16x32xf32>
    %193 = vector.broadcast %170 : vector<1x32xf32> to vector<16x32xf32>
    %194 = arith.mulf %192, %193 : vector<16x32xf32>
    %195 = vector.broadcast %172 : vector<1x32xf32> to vector<16x32xf32>
    %196 = arith.addf %194, %195 : vector<16x32xf32>
    %c0_82 = arith.constant 0 : index
    %c0_83 = arith.constant 0 : index
    %197 = vector.load %arg26[%c0_82, %c0_83] : memref<16x32xf32, #tpu.memory_space<vmem>>, vector<16x32xf32>
    tpu.vector_store %arg26[%c0_82, %c0_83], %196 {strides = array<i32>} : memref<16x32xf32, #tpu.memory_space<vmem>>, vector<16x32xf32>,
    %c1_i32 = arith.constant 1 : i32
    %198 = arith.cmpi eq, %arg0, %c1_i32 : i32
    %199 = arith.extui %198 : i1 to i32
    %c0_i32_84 = arith.constant 0 : i32
    %200 = arith.cmpi ne, %199, %c0_i32_84 : i32
    scf.if %200 {
      %201 = vector.extract_strided_slice %196 {offsets = [0, 0], sizes = [1, 32], strides = [1, 1]} : vector<16x32xf32> to vector<1x32xf32>
      %202 = vector.extract_strided_slice %196 {offsets = [8, 0], sizes = [1, 32], strides = [1, 1]} : vector<16x32xf32> to vector<1x32xf32>
      %203 = tpu.concatenate %201, %202 in 0 : vector<1x32xf32>, vector<1x32xf32> -> vector<2x32xf32>
      %204 = arith.truncf %203 : vector<2x32xf32> to vector<2x32xbf16>
      %c0_85 = arith.constant 0 : index
      %c0_86 = arith.constant 0 : index
      %205 = vector.load %arg21[%c0_85, %c0_86] : memref<32x32xbf16, #tpu.memory_space<vmem>>, vector<32x32xbf16>
      %cst_87 = arith.constant dense<0.000000e+00> : vector<2x32xf32>
      %206 = tpu.matmul %204, %205, %cst_87 {dimension_numbers = #tpu.dot_dimension_numbers<[1], [0], [0], [1], [0, 0, 1, 1], [], []>} : vector<2x32xbf16>, vector<32x32xbf16>, vector<2x32xf32> -> vector<2x32xf32>
      %c0_88 = arith.constant 0 : index
      %c0_89 = arith.constant 0 : index
      %207 = vector.load %arg22[%c0_88, %c0_89] : memref<1x32xf32, #tpu.memory_space<vmem>>, vector<1x32xf32>
      %208 = vector.broadcast %207 : vector<1x32xf32> to vector<2x32xf32>
      %209 = arith.addf %206, %208 : vector<2x32xf32>
      %210 = math.tanh %209 : vector<2x32xf32>
      %211 = arith.truncf %210 : vector<2x32xf32> to vector<2x32xbf16>
      %c0_90 = arith.constant 0 : index
      %c0_91 = arith.constant 0 : index
      %212 = vector.load %arg23[%c0_90, %c0_91] : memref<32x1xbf16, #tpu.memory_space<vmem>>, vector<32x1xbf16>
      %cst_92 = arith.constant dense<0.000000e+00> : vector<2x1xf32>
      %213 = tpu.matmul %211, %212, %cst_92 {dimension_numbers = #tpu.dot_dimension_numbers<[1], [0], [0], [1], [0, 0, 1, 1], [], []>} : vector<2x32xbf16>, vector<32x1xbf16>, vector<2x1xf32> -> vector<2x1xf32>
      %c0_93 = arith.constant 0 : index
      %c0_94 = arith.constant 0 : index
      %214 = vector.load %arg24[%c0_93, %c0_94] : memref<1x1xf32, #tpu.memory_space<vmem>>, vector<1x1xf32>
      %215 = vector.broadcast %214 : vector<1x1xf32> to vector<2x1xf32>
      %216 = arith.addf %213, %215 : vector<2x1xf32>
      %cst_95 = arith.constant dense<0xFF800000> : vector<1xf32>
      %217 = vector.multi_reduction <maximumf>, %216, %cst_95 [0] : vector<2x1xf32> to vector<1xf32>
      %218 = vector.shape_cast %217 : vector<1xf32> to vector<1x1xf32>
      %219 = vector.broadcast %218 : vector<1x1xf32> to vector<2x1xf32>
      %220 = arith.subf %216, %219 : vector<2x1xf32>
      %221 = math.exp %220 : vector<2x1xf32>
      %cst_96 = arith.constant dense<0.000000e+00> : vector<1xf32>
      %222 = vector.multi_reduction <add>, %221, %cst_96 [0] : vector<2x1xf32> to vector<1xf32>
      %223 = vector.shape_cast %222 : vector<1xf32> to vector<1x1xf32>
      %224 = vector.broadcast %223 : vector<1x1xf32> to vector<2x1xf32>
      %225 = arith.divf %221, %224 : vector<2x1xf32>
      %cst_97 = arith.constant 0.000000e+00 : f32
      %226 = vector.broadcast %cst_97 : f32 to vector<2x127xf32>
      %227 = tpu.concatenate %225, %226 in 1 : vector<2x1xf32>, vector<2x127xf32> -> vector<2x128xf32>
      %cst_98 = arith.constant 0.000000e+00 : f32
      %228 = vector.broadcast %cst_98 : f32 to vector<6x128xf32>
      %229 = tpu.concatenate %227, %228 in 0 : vector<2x128xf32>, vector<6x128xf32> -> vector<8x128xf32>
      %c0_99 = arith.constant 0 : index
      %c0_100 = arith.constant 0 : index
      %230 = vector.load %arg25[%c0_99, %c0_100] : memref<8x128xf32, #tpu.memory_space<vmem>>, vector<8x128xf32>
      tpu.vector_store %arg25[%c0_99, %c0_100], %229 {strides = array<i32>} : memref<8x128xf32, #tpu.memory_space<vmem>>, vector<8x128xf32>,
    } else {
    }
    return
  }
  func.func @transform_0(%arg0: i32) -> (i32, i32) {
    %c0_i32 = arith.constant 0 : i32
    %c0_i32_0 = arith.constant 0 : i32
    %c0_i32_1 = arith.constant 0 : i32
    return %c0_i32, %c0_i32_0 : i32, i32
  }
  func.func @transform_1(%arg0: i32) -> (i32, i32) {
    %c0_i32 = arith.constant 0 : i32
    %c0_i32_0 = arith.constant 0 : i32
    %c0_i32_1 = arith.constant 0 : i32
    return %c0_i32, %c0_i32_0 : i32, i32
  }
  func.func @transform_2(%arg0: i32) -> (i32, i32) {
    %c0_i32 = arith.constant 0 : i32
    %c0_i32_0 = arith.constant 0 : i32
    %c0_i32_1 = arith.constant 0 : i32
    return %c0_i32, %c0_i32_0 : i32, i32
  }
  func.func @transform_3(%arg0: i32) -> (i32, i32) {
    %c0_i32 = arith.constant 0 : i32
    %c0_i32_0 = arith.constant 0 : i32
    %c0_i32_1 = arith.constant 0 : i32
    return %c0_i32, %c0_i32_0 : i32, i32
  }
  func.func @transform_4(%arg0: i32) -> (i32, i32, i32) {
    %c0_i32 = arith.constant 0 : i32
    %c0_i32_0 = arith.constant 0 : i32
    %c0_i32_1 = arith.constant 0 : i32
    return %arg0, %c0_i32, %c0_i32_0 : i32, i32, i32
  }
  func.func @transform_5(%arg0: i32) -> (i32, i32, i32) {
    %c0_i32 = arith.constant 0 : i32
    %c0_i32_0 = arith.constant 0 : i32
    %c0_i32_1 = arith.constant 0 : i32
    return %arg0, %c0_i32, %c0_i32_0 : i32, i32, i32
  }
  func.func @transform_6(%arg0: i32) -> (i32, i32, i32) {
    %c0_i32 = arith.constant 0 : i32
    %c0_i32_0 = arith.constant 0 : i32
    %c0_i32_1 = arith.constant 0 : i32
    return %arg0, %c0_i32, %c0_i32_0 : i32, i32, i32
  }
  func.func @transform_7(%arg0: i32) -> (i32, i32, i32) {
    %c0_i32 = arith.constant 0 : i32
    %c0_i32_0 = arith.constant 0 : i32
    %c0_i32_1 = arith.constant 0 : i32
    return %arg0, %c0_i32, %c0_i32_0 : i32, i32, i32
  }
  func.func @transform_8(%arg0: i32) -> (i32, i32, i32) {
    %c0_i32 = arith.constant 0 : i32
    %c0_i32_0 = arith.constant 0 : i32
    %c0_i32_1 = arith.constant 0 : i32
    return %arg0, %c0_i32, %c0_i32_0 : i32, i32, i32
  }
  func.func @transform_9(%arg0: i32) -> (i32, i32, i32) {
    %c0_i32 = arith.constant 0 : i32
    %c0_i32_0 = arith.constant 0 : i32
    %c0_i32_1 = arith.constant 0 : i32
    return %arg0, %c0_i32, %c0_i32_0 : i32, i32, i32
  }
  func.func @transform_10(%arg0: i32) -> (i32, i32, i32) {
    %c0_i32 = arith.constant 0 : i32
    %c0_i32_0 = arith.constant 0 : i32
    %c0_i32_1 = arith.constant 0 : i32
    return %arg0, %c0_i32, %c0_i32_0 : i32, i32, i32
  }
  func.func @transform_11(%arg0: i32) -> (i32, i32, i32) {
    %c0_i32 = arith.constant 0 : i32
    %c0_i32_0 = arith.constant 0 : i32
    %c0_i32_1 = arith.constant 0 : i32
    return %arg0, %c0_i32, %c0_i32_0 : i32, i32, i32
  }
  func.func @transform_12(%arg0: i32) -> (i32, i32, i32) {
    %c0_i32 = arith.constant 0 : i32
    %c0_i32_0 = arith.constant 0 : i32
    %c0_i32_1 = arith.constant 0 : i32
    return %arg0, %c0_i32, %c0_i32_0 : i32, i32, i32
  }
  func.func @transform_13(%arg0: i32) -> (i32, i32, i32) {
    %c0_i32 = arith.constant 0 : i32
    %c0_i32_0 = arith.constant 0 : i32
    %c0_i32_1 = arith.constant 0 : i32
    return %arg0, %c0_i32, %c0_i32_0 : i32, i32, i32
  }
  func.func @transform_14(%arg0: i32) -> (i32, i32, i32) {
    %c0_i32 = arith.constant 0 : i32
    %c0_i32_0 = arith.constant 0 : i32
    %c0_i32_1 = arith.constant 0 : i32
    return %arg0, %c0_i32, %c0_i32_0 : i32, i32, i32
  }
  func.func @transform_15(%arg0: i32) -> (i32, i32, i32) {
    %c0_i32 = arith.constant 0 : i32
    %c0_i32_0 = arith.constant 0 : i32
    %c0_i32_1 = arith.constant 0 : i32
    return %arg0, %c0_i32, %c0_i32_0 : i32, i32, i32
  }
  func.func @transform_16(%arg0: i32) -> (i32, i32, i32) {
    %c0_i32 = arith.constant 0 : i32
    %c0_i32_0 = arith.constant 0 : i32
    %c0_i32_1 = arith.constant 0 : i32
    return %arg0, %c0_i32, %c0_i32_0 : i32, i32, i32
  }
  func.func @transform_17(%arg0: i32) -> (i32, i32, i32) {
    %c0_i32 = arith.constant 0 : i32
    %c0_i32_0 = arith.constant 0 : i32
    %c0_i32_1 = arith.constant 0 : i32
    return %arg0, %c0_i32, %c0_i32_0 : i32, i32, i32
  }
  func.func @transform_18(%arg0: i32) -> (i32, i32, i32) {
    %c0_i32 = arith.constant 0 : i32
    %c0_i32_0 = arith.constant 0 : i32
    %c0_i32_1 = arith.constant 0 : i32
    return %arg0, %c0_i32, %c0_i32_0 : i32, i32, i32
  }
  func.func @transform_19(%arg0: i32) -> (i32, i32, i32) {
    %c0_i32 = arith.constant 0 : i32
    %c0_i32_0 = arith.constant 0 : i32
    %c0_i32_1 = arith.constant 0 : i32
    return %arg0, %c0_i32, %c0_i32_0 : i32, i32, i32
  }
  func.func @transform_20(%arg0: i32) -> (i32, i32) {
    %c0_i32 = arith.constant 0 : i32
    %c0_i32_0 = arith.constant 0 : i32
    %c0_i32_1 = arith.constant 0 : i32
    return %c0_i32, %c0_i32_0 : i32, i32
  }
  func.func @transform_21(%arg0: i32) -> (i32, i32) {
    %c0_i32 = arith.constant 0 : i32
    %c0_i32_0 = arith.constant 0 : i32
    %c0_i32_1 = arith.constant 0 : i32
    return %c0_i32, %c0_i32_0 : i32, i32
  }
  func.func @transform_22(%arg0: i32) -> (i32, i32) {
    %c0_i32 = arith.constant 0 : i32
    %c0_i32_0 = arith.constant 0 : i32
    %c0_i32_1 = arith.constant 0 : i32
    return %c0_i32, %c0_i32_0 : i32, i32
  }
  func.func @transform_23(%arg0: i32) -> (i32, i32) {
    %c0_i32 = arith.constant 0 : i32
    %c0_i32_0 = arith.constant 0 : i32
    %c0_i32_1 = arith.constant 0 : i32
    return %c0_i32, %c0_i32_0 : i32, i32
  }
  func.func @transform_24(%arg0: i32) -> (i32, i32) {
    %c0_i32 = arith.constant 0 : i32
    %c0_i32_0 = arith.constant 0 : i32
    %c0_i32_1 = arith.constant 0 : i32
    return %c0_i32, %c0_i32_0 : i32, i32
  }
}

</mosaic_0001>

<bundles_post_ra>
// kernel: ernie_classifier_forward.1
= control target key start
LH: loop header
LB: loop body
LE: loop exit
PB: predicated region body
PF: predicated region fallthrough
CT: control target
= control target key end

     0   :  { %s2855_s27 = smov 0   ;;  %s3181_s0 = inlined_call_operand.vmem [shape: f32[16,32], index: 0, kind: input, shape index: {}]   ;;  %s3182_s1 = inlined_call_operand.vmem [shape: f32[1,16], index: 1, kind: input, shape index: {}]   ;;  %s3183_s2 = inlined_call_operand.vmem [shape: f32[1,32], index: 2, kind: input, shape index: {}]   ;;  %s3184_s3 = inlined_call_operand.vmem [shape: f32[1,32], index: 3, kind: input, shape index: {}]   ;;  %s3185_s4 = inlined_call_operand.vmem [shape: bf16[2,32,32], index: 4, kind: input, shape index: {}]   ;;  %s3186_s5 = inlined_call_operand.vmem [shape: f32[2,1,32], index: 5, kind: input, shape index: {}]   ;;  %s3187_s6 = inlined_call_operand.vmem [shape: bf16[2,32,32], index: 6, kind: input, shape index: {}]   ;;  %s3188_s7 = inlined_call_operand.vmem [shape: f32[2,1,32], index: 7, kind: input, shape index: {}]   ;;  %s3189_s8 = inlined_call_operand.vmem [shape: bf16[2,32,32], index: 8, kind: input, shape index: {}]   ;;  %s3190_s9 = inlined_call_operand.vmem [shape: f32[2,1,32], index: 9, kind: input, shape index: {}]   ;;  %s3191_s10 = inlined_call_operand.vmem [shape: bf16[2,32,32], index: 10, kind: input, shape index: {}]   ;;  %s3192_s11 = inlined_call_operand.vmem [shape: f32[2,1,32], index: 11, kind: input, shape index: {}]   ;;  %s3193_s12 = inlined_call_operand.vmem [shape: f32[2,1,32], index: 12, kind: input, shape index: {}]   ;;  %s3194_s13 = inlined_call_operand.vmem [shape: f32[2,1,32], index: 13, kind: input, shape index: {}]   ;;  %s3195_s14 = inlined_call_operand.vmem [shape: bf16[2,32,64], index: 14, kind: input, shape index: {}]   ;;  %s3196_s15 = inlined_call_operand.vmem [shape: f32[2,1,64], index: 15, kind: input, shape index: {}]   ;;  %s3197_s16 = inlined_call_operand.vmem [shape: bf16[2,64,32], index: 16, kind: input, shape index: {}]   ;;  %s3198_s17 = inlined_call_operand.vmem [shape: f32[2,1,32], index: 17, kind: input, shape index: {}]   ;;  %s3199_s18 = inlined_call_operand.vmem [shape: f32[2,1,32], index: 18, kind: input, shape index: {}]   ;;  %s3200_s19 = inlined_call_operand.vmem [shape: f32[2,1,32], index: 19, kind: input, shape index: {}]   ;;  %s3201_s20 = inlined_call_operand.vmem [shape: bf16[32,32], index: 20, kind: input, shape index: {}]   ;;  %s3202_s21 = inlined_call_operand.vmem [shape: f32[1,32], index: 21, kind: input, shape index: {}]   ;;  %s3203_s22 = inlined_call_operand.vmem [shape: bf16[32,1], index: 22, kind: input, shape index: {}]   ;;  %s3204_s23 = inlined_call_operand.<no memory space> [shape: f32[1,1], index: 23, kind: input, shape index: {}]   ;;  %s3205_s24 = inlined_call_operand.vmem [shape: f32[8,128], index: 24, kind: output, shape index: {}]  }
   0x1   :  { %3212 = sst [smem:[#allocation7_spill]] %s3181_s0  ;;  %v29_v0 = vstv %s3204_s23 }
   0x2   :  { %3213 = sst [smem:[#allocation8_spill]] %s3182_s1  ;;  %30 = vst [vmem:[#allocation3] sm:$0x1] %v29_v0 }
   0x3   :  { %3214 = sst [smem:[#allocation9_spill]] %s3183_s2 }
   0x4   :  { %3215 = sst [smem:[#allocation10_spill]] %s3184_s3 }
   0x5   :  { %3216 = sst [smem:[#allocation11_spill]] %s3185_s4 }
   0x6   :  { %3217 = sst [smem:[#allocation12_spill]] %s3186_s5 }
   0x7   :  { %3218 = sst [smem:[#allocation13_spill]] %s3187_s6 }
   0x8   :  { %3219 = sst [smem:[#allocation14_spill]] %s3188_s7 }
   0x9   :  { %3220 = sst [smem:[#allocation15_spill]] %s3189_s8 }
   0xa   :  { %3221 = sst [smem:[#allocation16_spill]] %s3191_s10 }
   0xb   :  { %3222 = sst [smem:[#allocation17_spill]] %s3201_s20 }
   0xc   :  { %3223 = sst [smem:[#allocation18_spill]] %s3202_s21 }
   0xd   :  { %3224 = sst [smem:[#allocation19_spill]] %s3203_s22 }
   0xe   :  { %3225 = sst [smem:[#allocation20_spill]] %s3205_s24 }
   0xf LB: > { %3226 = sst [smem:[#allocation4_spill]] %s2717_s27  ;;  %s2861_s28 = sadd.s32 4294967295, %s2717_s27   ;;  %s2717_s27 = sphi %s2855_s27, %s36_s27  }
  0x10   : > { %3227 = sst [smem:[#allocation5_spill]] %s2861_s28  ;;  %p2389_p0 = scmp.ge.s32.totalorder %s2717_s27, 1 }
  0x11   : > { %p789_p1 = scmp.lt.s32.totalorder %s2717_s27, 3 }
  0x13   : > { %p790_p2 = pnand %p2389_p0, %p789_p1 }
  0x15   : > { %793 = sbr.rel (%p790_p2) target bundleno = 3768 (0xeb8), region = 116 }
  0x1a   : > { %p905_p3 = scmp.lt.s32.totalorder %s2861_s28, 1  ;;  %s3229_s25 = sld [smem:[#allocation11_spill]] }
  0x1b   : > { %s3231_s5 = sld [smem:[#allocation13_spill]] }
  0x1c   : > { %s2867_s23 = scalar_select %p905_p3, %s2861_s28, 1 }
  0x1d   : > { %s3233_s2 = sld [smem:[#allocation15_spill]] }
  0x1e   : > { %s2455_s6 = sshll.u32 %s2867_s23, 4  ;;  %s3234_s10 = sld [smem:[#allocation16_spill]] }
  0x1f   : > { %s2917_s0 = scalar_lea.vmem %s3195_s14, %s2455_s6  ;;  %s958_s24 = scalar_lea.vmem %s3198_s17, %s2867_s23 }
  0x20   : > { %s2877_s8 = scalar_lea.vmem %s3229_s25, %s2455_s6  ;;  %s961_s20 = scalar_lea.vmem %s3199_s18, %s2867_s23 }
  0x21   : > { %3230 = sst [smem:[#allocation6_spill]] %s2877_s8  ;;  %s2882_s26 = scalar_lea.vmem %s3231_s5, %s2455_s6 }
  0x22   : > { %s964_s27 = scalar_lea.vmem %s3200_s19, %s2867_s23  ;;  %s3235_s3 = sld [smem:[#allocation5_spill]] }
  0x23   : > { %s2891_s29 = scalar_lea.vmem %s3233_s2, %s2455_s6 }
  0x24   : > { %s2900_s8 = scalar_lea.vmem %s3234_s10, %s2455_s6  ;;  %s2460_s10 = sshll.u32 %s2867_s23, 5 }
  0x25   : > { %s2927_s5 = scalar_lea.vmem %s3197_s16, %s2460_s10 }
  0x28   : > { %p2402_p4 = scmp.ne.s32.totalorder %s3235_s3, 0 }
  0x29   : > { %s3236_s4 = sld [smem:[#allocation7_spill]] (!%p2402_p4) }
  0x2a   : > { %969 = sbr.rel (%p2402_p4) target bundleno = 361 (0x169), region = 120  ;;  %s3237_s21 = sld [smem:[#allocation20_spill]] (!%p2402_p4) }
  0x2b   : > { %s3238_s6 = sld [smem:[#allocation9_spill]] (!%p2402_p4) }
  0x2c   : > { %s3239_s25 = sld [smem:[#allocation10_spill]] (!%p2402_p4) }
  0x2f   : > { %v970_v1 = vld [vmem:[%s3236_s4] sm:$0xff]  ;;  %vm974_vm0 = vcmask 261120   ;;  %v971_v2 = vld [vmem:[%s3236_s4 + $0x8] sm:$0xff]  ;;  %v2719_v15 = vmov 0.0  }
  0x30   : > { %v975_v3 = vsel %vm974_vm0, %v970_v1, 0.0  ;;  %v978_v4 = vsel %vm974_vm0, %v971_v2, 0.0  ;;  %1020 = vst [vmem:[%s3237_s21] sm:$0xff] %v2719_v15 }
  0x31   : > { %976 = vadd.xlane.f32.xlu0 %v975_v3  ;;  %v2403_v23 = vld [vmem:[%s3238_s6] ss:$0 sm:$0xff] }
  0x32   : > { %v2404_v25 = vld [vmem:[%s3239_s25] ss:$0 sm:$0xff] }
  0x35   : > { %979 = vadd.xlane.f32.xlu0 %v978_v4 }
  0xba   : > { %v977_v5 = vpop.xlane.xlu0 %976 }
  0xbb   : > { %v982_v6 = vmul.f32 0.03125, %v977_v5 }
  0xbd   : > { %v984_v7 = vsub.f32 %v970_v1, %v982_v6 }
  0xbe   : > { %v980_v8 = vpop.xlane.xlu0 %979 }
  0xbf   : > { %v983_v9 = vmul.f32 0.03125, %v980_v8  ;;  %v986_v10 = vmul.f32 %v984_v7, %v984_v7 }
  0xc1   : > { %v985_v11 = vsub.f32 %v971_v2, %v983_v9  ;;  %v988_v12 = vsel %vm974_vm0, %v986_v10, 0.0 }
  0xc2   : > { %989 = vadd.xlane.f32.xlu1 %v988_v12 }
  0xc3   : > { %v987_v13 = vmul.f32 %v985_v11, %v985_v11 }
  0xc5   : > { %v991_v14 = vsel %vm974_vm0, %v987_v13, 0.0 }
  0xc6   : > { %992 = vadd.xlane.f32.xlu1 %v991_v14 }
 0x14b   : > { %v990_v16 = vpop.xlane.xlu1 %989 }
 0x14c   : > { %v994_v17 = vmul.f32 0.03125, %v990_v16 }
 0x14e   : > { %v996_v18 = vadd.f32 1e-12, %v994_v17 }
 0x14f   : > { %v993_v19 = vpop.xlane.xlu1 %992 }
 0x150   : > { %2635 = vrsqrt.f32 %v996_v18  ;;  %v995_v20 = vmul.f32 0.03125, %v993_v19 }
 0x152   : > { %v997_v21 = vadd.f32 1e-12, %v995_v20 }
 0x154   : > { %2637 = vrsqrt.f32 %v997_v21 }
 0x15d   : > { %v2636_v22 = vpop.eup %2635 }
 0x15e   : > { %v1000_v24 = vmul.f32 %v2636_v22, %v984_v7 }
 0x160   : > { %v1008_v26 = vmul.f32 %v2403_v23, %v1000_v24 }
 0x161   : > { %v2638_v27 = vpop.eup %2637 }
 0x162   : > { %v1016_v28 = vadd.f32 %v2404_v25, %v1008_v26  ;;  %v1001_v29 = vmul.f32 %v2638_v27, %v985_v11 }
 0x164   : > { %1018 = vst.msk [vmem:[#allocation2] sm:$0xff] %vm974_vm0, %v1016_v28  ;;  %v1009_v30 = vmul.f32 %v2403_v23, %v1001_v29 }
 0x166   : > { %v1017_v31 = vadd.f32 %v2404_v25, %v1009_v30 }
 0x168   : > { %1019 = vst.msk [vmem:[#allocation2 + $0x8] sm:$0xff] %vm974_vm0, %v1017_v31 }
 0x169 PF: > { %s3240_s10 = sld [smem:[#allocation6_spill]]  ;;  %v2659_v32 = vld [vmem:[%s2882_s26 + $0x8] sm:$0xff]   ;;  %v2720_v33 = vmov 0.0   ;;  %v2661_v35 = vld [vmem:[%s2882_s26] sm:$0xff]   ;;  %vm2721_vm1 = vmmov 0   ;;  %vm1047_vm2 = vcmask 261120   ;;  %s3245_s25 = scalar_lea.vmem %s3190_s9, %s2867_s23  ;;  %v1256_v22 = vlaneseq }
 0x16a   : > { %2511 = vmatprep.subr.bf16.mxu1 %v2720_v33  ;;  %2503 = vmatprep.subr.bf16.mxu0 %v2720_v33  ;;  %v2663_v40 = vld [vmem:[%s2891_s29 + $0x8] sm:$0xff]   ;;  %v2664_v41 = vld [vmem:[%s2891_s29] sm:$0xff]   ;;  %s3241_s30 = sld [smem:[#allocation12_spill]]  ;;  %vm1261_vm3 = vcmask 130048   ;;  %s2722_s6 = smov 112   ;;  %vm1382_vm4 = vcmask 1043456  }
 0x16b   : > { %2512 = vmatpush3.bf16.msra.mxu1 %v2659_v32  ;;  %2515 = vmatprep.mubr.msk.bf16.mxu1 %vm2721_vm1, %v2720_v33  ;;  %v2975_v37 = vld [vmem:[#allocation2] sm:$0xff]  ;;  %s3243_s29 = sld [smem:[#allocation14_spill]]  ;;  %v1257_v25 = vshrl.u32 %v1256_v22, 7  ;;  %vm1354_vm5 = vcmask 64512   ;;  %s3247_s22 = scalar_lea.vmem %s3192_s11, %s2867_s23  ;;  %vm1946_vm6 = vcmask 523264  }
 0x16c   : > { %2513 = vmatprep.subr.bf16.mxu1 %v2720_v33  ;;  %2507 = vmatprep.mubr.msk.bf16.mxu0 %vm2721_vm1, %v2720_v33  ;;  %v2413_v63 = vld [vmem:[%s3245_s25] ss:$0 sm:$0xff]  ;;  %s3246_s1 = sld [smem:[#allocation8_spill]]  ;;  %s3249_s3 = scalar_lea.vmem %s3194_s13, %s2867_s23 }
 0x16d   : > { %v1258_v27 = vsub.s32 0, %v1257_v25  ;;  %s3250_s26 = scalar_lea.vmem %s3196_s15, %s2867_s23  ;;  %s3251_s21 = sld [smem:[#allocation5_spill]] }
 0x16f   : > { %v2660_v34 = vld [vmem:[%s3240_s10 + $0x8] sm:$0xff]   ;;  %v2662_v36 = vld [vmem:[%s3240_s10] sm:$0xff]   ;;  %2514 = vmatpush3.bf16.msra.mxu1 %v2661_v35 }
 0x170   : > { %2504 = vmatpush3.bf16.msra.mxu0 %v2660_v34  ;;  %v2977_v38 = vld [vmem:[#allocation2 + $0x8] sm:$0xff]  ;;  %2527 = vmatprep.subr.bf16.mxu1 %v2720_v33  ;;  %s3242_s2 = scalar_lea.vmem %s3241_s30, %s2867_s23  ;;  %s2723_s30 = smov 120  }
 0x171   : > { %2505 = vmatprep.subr.bf16.mxu0 %v2720_v33  ;;  %v1023_v39 = vpack.c.bf16 %v2977_v38, %v2975_v37  ;;  %v2405_v42 = vld [vmem:[%s3242_s2] ss:$0 sm:$0xff]  ;;  %s3244_s28 = scalar_lea.vmem %s3243_s29, %s2867_s23  ;;  %s2724_s2 = smov 16  }
 0x172   : > { %v2409_v45 = vld [vmem:[%s3244_s28] ss:$0 sm:$0xff] }
 0x173   : > { %2516 = vmatmul.mubr.msk.bf16.vlgmr.msra.gmra.mxu1 %vm1047_vm2, %v1023_v39  ;;  %v1252_v23 = vld [vmem:[%s3246_s1] sm:$0x1]  ;;  %p2444_p5 = scmp.ne.s32.totalorder %s3251_s21, 1 }
 0x174   : > { %2506 = vmatpush3.bf16.msra.mxu0 %v2662_v36  ;;  %2529 = vmatprep.mubr.msk.bf16.mxu1 %vm2721_vm1, %v2720_v33  ;;  %v2417_v24 = vadd.f32 -1.0, %v1252_v23  ;;  %s3252_s29 = sld [smem:[#allocation17_spill]] (!%p2444_p5) }
 0x175   : > { %2519 = vmatprep.subr.bf16.mxu0 %v2720_v33 }
 0x176   : > { %v1254_v26 = vmul.f32 1e+09, %v2417_v24 }
 0x177   : > { %2508 = vmatmul.mubr.msk.bf16.vlgmr.msra.gmra.mxu0 %vm1047_vm2, %v1023_v39 }
 0x178   : > { %2523 = vmatprep.mubr.msk.bf16.mxu0 %vm2721_vm1, %v2720_v33  ;;  %2520 = vmatpush3.bf16.msra.mxu0 %v2663_v40  ;;  %v1259_v28 = vrot.slane %v1254_v26, %v1258_v27 }
 0x179   : > { %2521 = vmatprep.subr.bf16.mxu0 %v2720_v33 }
 0x17c   : > { %2522 = vmatpush3.bf16.msra.mxu0 %v2664_v41 }
 0x17d   : > { %2533 = vmatprep.subr.bf16.mxu0 %v2720_v33 }
 0x17f   : > { %2524 = vmatmul.mubr.msk.bf16.vlgmr.msra.gmra.mxu0 %vm1047_vm2, %v1023_v39 }
 0x180   : > { %2535 = vmatprep.mubr.msk.bf16.mxu0 %vm2721_vm1, %v2720_v33 }
 0x233   : > { %v1149_v43 = vpop.f32.mrf.mxu1 }
 0x234   : > { %v1150_v50 = vadd.f32 %v2409_v45, %v1149_v43 }
 0x235   : > { %v2517_v47 = vpop.f32.mrf.mxu1 }
 0x237   : > { %v1085_v44 = vpop.f32.mrf.mxu0  ;;  %v1152_v49 = vpop.f32.mrf.mxu1 }
 0x238   : > { %v1086_v46 = vadd.f32 %v2405_v42, %v1085_v44  ;;  %v1153_v51 = vadd.f32 %v2409_v45, %v1152_v49 }
 0x239   : > { %v2509_v48 = vpop.f32.mrf.mxu0  ;;  %v2518_v55 = vpop.f32.mrf.mxu1 }
 0x23a   : > { %v1220_v53 = vmul.f32 0.25, %v1086_v46  ;;  %v3006_v56 = vpack.c.bf16 %v1153_v51, %v1150_v50  ;;  %v2639_v58 = vpack.i.bf16 %v1153_v51, %v1150_v50 }
 0x23b   : > { %v1088_v52 = vpop.f32.mrf.mxu0 }
 0x23c   : > { %v1089_v54 = vadd.f32 %v2405_v42, %v1088_v52  ;;  %2640 = vrot.lane.b32.xlu0 %v2639_v58, %s2722_s6  ;;  %v1266_v60 = vsel %vm1261_vm3, %v3006_v56, 0 }
 0x23d   : > { %v2510_v57 = vpop.f32.mrf.mxu0  ;;  %2528 = vmatpush3.bf16.xpose.msra.mxu1 %v1266_v60 }
 0x23e   : > { %v1221_v59 = vmul.f32 0.25, %v1089_v54  ;;  %2539 = vmatprep.subr.bf16.mxu1 %v2720_v33 }
 0x23f   : > { %v1213_v0 = vpop.f32.mrf.mxu0 }
 0x240   : > { %v2644_v61 = vpack.i.bf16 %v1221_v59, %v1220_v53  ;;  %v3013_v62 = vpack.c.bf16 %v1221_v59, %v1220_v53  ;;  %v1214_v2 = vadd.f32 %v2413_v63, %v1213_v0  ;;  %v1480_v0 = vrot.slane %v3006_v56, 4 }
 0x241   : > { %v2525_v1 = vpop.f32.mrf.mxu0 }
 0x242   : > { %2645 = vrot.lane.b32.xlu0 %v2644_v61, %s2722_s6 }
 0x243   : > { %v1216_v3 = vpop.f32.mrf.mxu0 }
 0x244   : > { %2530 = vmatmul.mubr.msk.bf16.vlgmr.msra.gmra.mxu1 %vm1261_vm3, %v3013_v62  ;;  %v1217_v4 = vadd.f32 %v2413_v63, %v1216_v3 }
 0x245   : > { %2541 = vmatprep.mubr.msk.bf16.mxu1 %vm2721_vm1, %v2720_v33  ;;  %v2526_v5 = vpop.f32.mrf.mxu0 }
 0x246   : > { %v2649_v6 = vpack.i.bf16 %v1217_v4, %v1214_v2  ;;  %v3024_v7 = vpack.c.bf16 %v1217_v4, %v1214_v2  ;;  %v1488_v4 = vsel %vm1261_vm3, %v1480_v0, 0 }
 0x248   : > { %v1384_v8 = vsel %vm1382_vm4, %v3024_v7, 0 }
 0x249   : > { %2540 = vmatpush3.bf16.msra.mxu1 %v1384_v8 }
 0x24a   : > { %2551 = vmatprep.subr.bf16.mxu1 %v2720_v33 }
 0x2ae   : > { %v2641_v9 = vpop.permute.xlu0 %2640 }
 0x2af   : > { %v2643_v10 = vunpack.i.h.bf16 %v2641_v9  ;;  %v2642_v11 = vunpack.i.l.bf16 %v2641_v9  ;;  %v1478_v9 = vrot.slane %v3013_v62, 4 }
 0x2b1   : > { %v3029_v12 = vpack.c.bf16 %v2643_v10, %v2642_v11 }
 0x2b3   : > { %v1312_v14 = vsel %vm1261_vm3, %v3029_v12, 0  ;;  %v1533_v60 = vrot.slane %v3029_v12, 4 }
 0x2b4   : > { %v2646_v13 = vpop.permute.xlu0 %2645  ;;  %2534 = vmatpush3.bf16.xpose.msra.mxu0 %v1312_v14 }
 0x2b5   : > { %v2648_v15 = vunpack.i.h.bf16 %v2646_v13  ;;  %v2647_v16 = vunpack.i.l.bf16 %v2646_v13  ;;  %2545 = vmatprep.subr.bf16.mxu0 %v2720_v33  ;;  %v1538_v1 = vsel %vm1261_vm3, %v1533_v60, 0 }
 0x2b7   : > { %v3034_v17 = vpack.c.bf16 %v2648_v15, %v2647_v16 }
 0x2b9   : > { %v1531_v56 = vrot.slane %v3034_v17, 4 }
 0x2bb   : > { %2536 = vmatmul.mubr.msk.bf16.vlgmr.msra.gmra.mxu0 %vm1261_vm3, %v3034_v17 }
 0x2bc   : > { %2547 = vmatprep.mubr.msk.bf16.mxu0 %vm2721_vm1, %v2720_v33 }
 0x304   : > { %v1302_v18 = vpop.f32.mrf.mxu1 }
 0x305   : > { %v1303_v32 = vadd.f32 %v1302_v18, %v1259_v28 }
 0x306   : > { %v2531_v19 = vpop.f32.mrf.mxu1 }
 0x307   : > { %v1355_v39 = vsel %vm1354_vm5, %v1303_v32, -inf }
 0x308   : > { %v1305_v20 = vpop.f32.mrf.mxu1 }
 0x30a   : > { %v2532_v21 = vpop.f32.mrf.mxu1 }
 0x37b   : > { %v1348_v29 = vpop.f32.mrf.mxu0 }
 0x37c   : > { %v1349_v30 = vadd.f32 %v1348_v29, %v1259_v28 }
 0x37d   : > { %v2537_v31 = vpop.f32.mrf.mxu0 }
 0x37e   : > { %v1358_v34 = vsel %vm1354_vm5, %v1349_v30, -inf }
 0x37f   : > { %1359 = vmax.xlane.f32.xlu1 %v1358_v34  ;;  %v1351_v35 = vpop.f32.mrf.mxu0 }
 0x381   : > { %v2538_v36 = vpop.f32.mrf.mxu0 }
 0x383   : > { %1356 = vmax.xlane.f32.xlu1 %v1355_v39 }
 0x394   : > { %2650 = vrot.lane.b32.xlu1 %v2649_v6, %s2722_s6  ;;  %v1605_v6 = vrot.slane %v3024_v7, 4  ;;  %s3253_s6 = sld [smem:[#allocation19_spill]] (!%p2444_p5) }
 0x396   : > { %v1610_v10 = vsel %vm1382_vm4, %v1605_v6, 0 }
 0x408   : > { %v1360_v40 = vpop.xlane.xlu1 %1359 }
 0x409   : > { %v1362_v41 = vsub.f32 %v1349_v30, %v1360_v40 }
 0x40b   : > { %v1365_v42 = vmul.f32 1.442695, %v1362_v41 }
 0x40c   : > { %v1357_v43 = vpop.xlane.xlu1 %1356 }
 0x40d   : > { %2673 = vpow2.f32 %v1365_v42  ;;  %v1361_v44 = vsub.f32 %v1303_v32, %v1357_v43 }
 0x40f   : > { %v1363_v45 = vmul.f32 1.442695, %v1361_v44 }
 0x410   : > { %v2651_v46 = vpop.permute.xlu1 %2650 }
 0x411   : > { %2675 = vpow2.f32 %v1363_v45  ;;  %v2653_v47 = vunpack.i.h.bf16 %v2651_v46  ;;  %v2652_v48 = vunpack.i.l.bf16 %v2651_v46 }
 0x413   : > { %v1251_v49 = vpack.c.bf16 %v2653_v47, %v2652_v48 }
 0x415   : > { %v1430_v50 = vsel %vm1382_vm4, %v1251_v49, 0  ;;  %v1653_v5 = vrot.slane %v1251_v49, 4 }
 0x416   : > { %2546 = vmatpush3.bf16.msra.mxu0 %v1430_v50 }
 0x417   : > { %2557 = vmatprep.subr.bf16.mxu0 %v2720_v33  ;;  %v1658_v8 = vsel %vm1382_vm4, %v1653_v5, 0 }
 0x41a   : > { %v2674_v51 = vpop.eup %2673 }
 0x41b   : > { %v1370_v52 = vsel %vm1354_vm5, %v2674_v51, 0.0 }
 0x41c   : > { %1371 = vadd.xlane.f32.xlu0 %v1370_v52  ;;  %v2666_v52 = vld [vmem:[%s2900_s8] sm:$0xff]  }
 0x41e   : > { %v2676_v53 = vpop.eup %2675 }
 0x41f   : > { %v1367_v54 = vsel %vm1354_vm5, %v2676_v53, 0.0 }
 0x420   : > { %1368 = vadd.xlane.f32.xlu1 %v1367_v54 }
 0x432   : > { %1481 = vrot.lane.b32.xlu0 %v1259_v28, %s2723_s30 }
 0x4a5   : > { %v1372_v55 = vpop.xlane.xlu0 %1371 }
 0x4a6   : > { %2677 = vrcp.f32 %v1372_v55 }
 0x4a9   : > { %v1369_v57 = vpop.xlane.xlu1 %1368  ;;  %v1482_v14 = vpop.permute.xlu0 %1481 }
 0x4aa   : > { %2679 = vrcp.f32 %v1369_v57 }
 0x4b3   : > { %v2678_v58 = vpop.eup %2677 }
 0x4b4   : > { %v1376_v59 = vmul.f32 %v2678_v58, %v2674_v51  ;;  %v2665_v51 = vld [vmem:[%s2900_s8 + $0x8] sm:$0xff]  }
 0x4b6   : > { %v1378_v61 = vpack.c.bf16 %v1376_v59, %v1376_v59 }
 0x4b7   : > { %v2680_v63 = vpop.eup %2679 }
 0x4b8   : > { %2548 = vmatmul.mubr.msk.bf16.vlgmr.msra.gmra.mxu0 %vm1354_vm5, %v1378_v61  ;;  %v1375_v2 = vmul.f32 %v2680_v63, %v2676_v53 }
 0x4b9   : > { %2558 = vmatpush3.bf16.xpose.msra.mxu0 %v1538_v1  ;;  %2559 = vmatprep.mubr.msk.bf16.mxu0 %vm2721_vm1, %v2720_v33 }
 0x4ba   : > { %v1377_v3 = vpack.c.bf16 %v1375_v2, %v1375_v2  ;;  %2569 = vmatprep.subr.bf16.mxu0 %v2720_v33 }
 0x4bc   : > { %2542 = vmatmul.mubr.msk.bf16.vlgmr.msra.gmra.mxu1 %vm1354_vm5, %v1377_v3 }
 0x4bd   : > { %2552 = vmatpush3.bf16.xpose.msra.mxu1 %v1488_v4  ;;  %2553 = vmatprep.mubr.msk.bf16.mxu1 %vm2721_vm1, %v2720_v33 }
 0x4be   : > { %2563 = vmatprep.subr.bf16.mxu1 %v2720_v33 }
 0x4c0   : > { %2560 = vmatmul.mubr.msk.bf16.vlgmr.msra.gmra.mxu0 %vm1261_vm3, %v1531_v56  ;;  %v2426_v56 = vld [vmem:[%s3247_s22] ss:$0 sm:$0xff] }
 0x4c1   : > { %2570 = vmatpush3.bf16.msra.mxu0 %v1658_v8  ;;  %2571 = vmatprep.mubr.msk.bf16.mxu0 %vm2721_vm1, %v2720_v33 }
 0x4c2   : > { %2583 = vmatprep.subr.bf16.mxu0 %v2720_v33 }
 0x4c4   : > { %2554 = vmatmul.mubr.msk.bf16.vlgmr.msra.gmra.mxu1 %vm1261_vm3, %v1478_v9 }
 0x4c5   : > { %2564 = vmatpush3.bf16.msra.mxu1 %v1610_v10  ;;  %2565 = vmatprep.mubr.msk.bf16.mxu1 %vm2721_vm1, %v2720_v33 }
 0x4c6   : > { %2575 = vmatprep.subr.bf16.mxu1 %v2720_v33 }
 0x578   : > { %v1466_v7 = vpop.f32.mrf.mxu0 }
 0x57a   : > { %v2549_v11 = vpop.f32.mrf.mxu0 }
 0x57c   : > { %v3075_v12 = vpop.f32.mrf.mxu1  ;;  %v1469_v13 = vpop.f32.mrf.mxu0 }
 0x57e   : > { %v2543_v15 = vpop.f32.mrf.mxu1  ;;  %v2550_v62 = vpop.f32.mrf.mxu0 }
 0x580   : > { %v1423_v16 = vpop.f32.mrf.mxu1  ;;  %v1574_v17 = vpop.f32.mrf.mxu0 }
 0x581   : > { %v1575_v18 = vadd.f32 %v1574_v17, %v1482_v14 }
 0x582   : > { %v2544_v19 = vpop.f32.mrf.mxu1  ;;  %v2561_v20 = vpop.f32.mrf.mxu0 }
 0x583   : > { %v1583_v21 = vsel %vm1354_vm5, %v1575_v18, -inf }
 0x584   : > { %v1524_v22 = vpop.f32.mrf.mxu1  ;;  %1584 = vmax.xlane.f32.xlu0 %v1583_v21  ;;  %v1577_v23 = vpop.f32.mrf.mxu0 }
 0x585   : > { %v1525_v24 = vadd.f32 %v1524_v22, %v1482_v14 }
 0x586   : > { %v2555_v25 = vpop.f32.mrf.mxu1  ;;  %v2562_v26 = vpop.f32.mrf.mxu0 }
 0x587   : > { %v1580_v27 = vsel %vm1354_vm5, %v1525_v24, -inf }
 0x588   : > { %1581 = vmax.xlane.f32.xlu1 %v1580_v27  ;;  %v1527_v28 = vpop.f32.mrf.mxu1 }
 0x58a   : > { %v2556_v29 = vpop.f32.mrf.mxu1 }
 0x60d   : > { %v1585_v30 = vpop.xlane.xlu0 %1584 }
 0x60e   : > { %v1587_v31 = vsub.f32 %v1575_v18, %v1585_v30 }
 0x610   : > { %v1590_v32 = vmul.f32 1.442695, %v1587_v31 }
 0x611   : > { %v1582_v34 = vpop.xlane.xlu1 %1581 }
 0x612   : > { %2681 = vpow2.f32 %v1590_v32  ;;  %v1586_v35 = vsub.f32 %v1525_v24, %v1582_v34  ;;  %v2668_v24 = vld [vmem:[%s2917_s0] sm:$0xff]  }
 0x614   : > { %v1588_v36 = vmul.f32 1.442695, %v1586_v35 }
 0x616   : > { %2683 = vpow2.f32 %v1588_v36 }
 0x61f   : > { %v2682_v39 = vpop.eup %2681 }
 0x620   : > { %v1595_v40 = vsel %vm1354_vm5, %v2682_v39, 0.0 }
 0x621   : > { %1596 = vadd.xlane.f32.xlu1 %v1595_v40  ;;  %v2431_v40 = vld [vmem:[%s3249_s3] ss:$0 sm:$0xff] }
 0x623   : > { %v2684_v41 = vpop.eup %2683 }
 0x624   : > { %v1592_v42 = vsel %vm1354_vm5, %v2684_v41, 0.0 }
 0x625   : > { %1593 = vadd.xlane.f32.xlu1 %v1592_v42 }
 0x6aa   : > { %v1597_v43 = vpop.xlane.xlu1 %1596 }
 0x6ab   : > { %2685 = vrcp.f32 %v1597_v43 }
 0x6ae   : > { %v1594_v44 = vpop.xlane.xlu1 %1593 }
 0x6af   : > { %2687 = vrcp.f32 %v1594_v44 }
 0x6b8   : > { %v2686_v45 = vpop.eup %2685 }
 0x6b9   : > { %v1601_v46 = vmul.f32 %v2686_v45, %v2682_v39  ;;  %v2669_v45 = vld [vmem:[%s2927_s5 + $0x18] sm:$0xff]  }
 0x6bb   : > { %v1603_v47 = vpack.c.bf16 %v1601_v46, %v1601_v46  ;;  %v2670_v46 = vld [vmem:[%s2927_s5 + $0x10] sm:$0xff]  }
 0x6bc   : > { %v2688_v48 = vpop.eup %2687 }
 0x6bd   : > { %2572 = vmatmul.mubr.msk.bf16.vlgmr.msra.gmra.mxu0 %vm1354_vm5, %v1603_v47  ;;  %v1600_v49 = vmul.f32 %v2688_v48, %v2684_v41  ;;  %v2671_v47 = vld [vmem:[%s2927_s5 + $0x8] sm:$0xff]   ;;  %v2672_v48 = vld [vmem:[%s2927_s5] sm:$0xff]  }
 0x6be   : > { %2587 = vmatprep.mubr.msk.bf16.mxu0 %vm2721_vm1, %v2720_v33 }
 0x6bf   : > { %v1602_v50 = vpack.c.bf16 %v1600_v49, %v1600_v49  ;;  %v2432_v49 = vld [vmem:[%s3250_s26] ss:$0 sm:$0xff]  ;;  %s3254_s26 = sld [smem:[#allocation18_spill]] (!%p2444_p5) }
 0x6c1   : > { %2566 = vmatmul.mubr.msk.bf16.vlgmr.msra.gmra.mxu1 %vm1354_vm5, %v1602_v50 }
 0x6c2   : > { %2579 = vmatprep.mubr.msk.bf16.mxu1 %vm2721_vm1, %v2720_v33  ;;  %2576 = vmatpush3.bf16.msra.mxu1 %v2665_v51 }
 0x6c3   : > { %2577 = vmatprep.subr.bf16.mxu1 %v2720_v33 }
 0x6c6   : > { %2578 = vmatpush3.bf16.msra.mxu1 %v2666_v52 }
 0x6c7   : > { %2591 = vmatprep.subr.bf16.mxu1 %v2720_v33 }
 0x77d   : > { %v1694_v53 = vpop.f32.mrf.mxu0 }
 0x77e   : > { %v2654_v54 = vpack.i.bf16 %v1694_v53, %v1466_v7 }
 0x77f   : > { %v2573_v55 = vpop.f32.mrf.mxu0 }
 0x780   : > { %2655 = vrot.lane.b32.xlu1 %v2654_v54, %s2724_s2 }
 0x781   : > { %v1646_v57 = vpop.f32.mrf.mxu1  ;;  %v1697_v58 = vpop.f32.mrf.mxu0 }
 0x783   : > { %v2567_v59 = vpop.f32.mrf.mxu1  ;;  %v2574_v60 = vpop.f32.mrf.mxu0 }
 0x785   : > { %v1649_v61 = vpop.f32.mrf.mxu1 }
 0x787   : > { %v2568_v63 = vpop.f32.mrf.mxu1 }
 0x7f2   : > { %v2656_v0 = vpop.permute.xlu1 %2655 }
 0x7f3   : > { %v2658_v1 = vunpack.i.h.bf16 %v2656_v0  ;;  %v2657_v2 = vunpack.i.l.bf16 %v2656_v0 }
 0x7f5   : > { %v1704_v3 = vsel %vm1261_vm3, %v1646_v57, %v2658_v1  ;;  %v1476_v4 = vsel %vm1261_vm3, %v3075_v12, %v2657_v2 }
 0x7f6   : > { %v1705_v5 = vpack.c.bf16 %v1704_v3, %v1476_v4 }
 0x7f8   : > { %2580 = vmatmul.mubr.msk.bf16.vlgmr.msra.gmra.mxu1 %vm1047_vm2, %v1705_v5 }
 0x7f9   : > { %2599 = vmatprep.mubr.msk.bf16.mxu1 %vm2721_vm1, %v2720_v33  ;;  %2592 = vmatpush3.bf16.msra.mxu1 %v2669_v45 }
 0x7fa   : > { %2593 = vmatprep.subr.bf16.mxu1 %v2720_v33 }
 0x7fd   : > { %2594 = vmatpush3.bf16.msra.mxu1 %v2670_v46 }
 0x7fe   : > { %2595 = vmatprep.subr.bf16.mxu1 %v2720_v33 }
 0x801   : > { %2596 = vmatpush3.bf16.msra.mxu1 %v2671_v47 }
 0x802   : > { %2597 = vmatprep.subr.bf16.mxu1 %v2720_v33 }
 0x805   : > { %2598 = vmatpush3.bf16.msra.mxu1 %v2672_v48 }
 0x8b8   : > { %v1766_v6 = vpop.f32.mrf.mxu1 }
 0x8b9   : > { %v1767_v8 = vadd.f32 %v2426_v56, %v1766_v6 }
 0x8ba   : > { %v2581_v9 = vpop.f32.mrf.mxu1 }
 0x8bb   : > { %v1773_v10 = vadd.f32 %v1767_v8, %v2975_v37 }
 0x8bc   : > { %v1769_v7 = vpop.f32.mrf.mxu1 }
 0x8bd   : > { %v1770_v11 = vadd.f32 %v2426_v56, %v1769_v7  ;;  %v1777_v12 = vsel %vm1047_vm2, %v1773_v10, 0.0 }
 0x8be   : > { %1778 = vadd.xlane.f32.xlu1 %v1777_v12  ;;  %v2582_v13 = vpop.f32.mrf.mxu1 }
 0x8bf   : > { %v1774_v14 = vadd.f32 %v1770_v11, %v2977_v38  ;;  %v2667_v38 = vld [vmem:[%s2917_s0 + $0x8] sm:$0xff]   ;;  %s3248_s0 = scalar_lea.vmem %s3193_s12, %s2867_s23  ;;  %v2436_v11 = vld [vmem:[%s958_s24] ss:$0 sm:$0xff]  ;;  %s3255_s24 = sld [smem:[#allocation20_spill]] (!%p2444_p5) }
 0x8c0   : > { %2584 = vmatpush3.bf16.msra.mxu0 %v2667_v38  ;;  %v2430_v34 = vld [vmem:[%s3248_s0] ss:$0 sm:$0xff] }
 0x8c1   : > { %v1780_v15 = vsel %vm1047_vm2, %v1774_v14, 0.0  ;;  %2585 = vmatprep.subr.bf16.mxu0 %v2720_v33 }
 0x8c2   : > { %1781 = vadd.xlane.f32.xlu0 %v1780_v15 }
 0x8c4   : > { %2586 = vmatpush3.bf16.msra.mxu0 %v2668_v24 }
 0x947   : > { %v1779_v62 = vpop.xlane.xlu1 %1778 }
 0x948   : > { %v1784_v16 = vmul.f32 0.03125, %v1779_v62 }
 0x94a   : > { %v1786_v17 = vsub.f32 %v1773_v10, %v1784_v16 }
 0x94b   : > { %v1782_v18 = vpop.xlane.xlu0 %1781 }
 0x94c   : > { %v1785_v19 = vmul.f32 0.03125, %v1782_v18  ;;  %v1788_v20 = vmul.f32 %v1786_v17, %v1786_v17 }
 0x94e   : > { %v1787_v37 = vsub.f32 %v1774_v14, %v1785_v19  ;;  %v1790_v21 = vsel %vm1047_vm2, %v1788_v20, 0.0 }
 0x94f   : > { %1791 = vadd.xlane.f32.xlu0 %v1790_v21 }
 0x950   : > { %v1789_v22 = vmul.f32 %v1787_v37, %v1787_v37 }
 0x952   : > { %v1793_v23 = vsel %vm1047_vm2, %v1789_v22, 0.0 }
 0x953   : > { %1794 = vadd.xlane.f32.xlu0 %v1793_v23 }
 0x9d8   : > { %v1792_v25 = vpop.xlane.xlu0 %1791 }
 0x9d9   : > { %v1796_v26 = vmul.f32 0.03125, %v1792_v25 }
 0x9db   : > { %v1798_v27 = vadd.f32 1e-12, %v1796_v26 }
 0x9dc   : > { %v1795_v28 = vpop.xlane.xlu0 %1794 }
 0x9dd   : > { %2689 = vrsqrt.f32 %v1798_v27  ;;  %v1797_v29 = vmul.f32 0.03125, %v1795_v28 }
 0x9df   : > { %v1799_v30 = vadd.f32 1e-12, %v1797_v29 }
 0x9e1   : > { %2691 = vrsqrt.f32 %v1799_v30 }
 0x9ea   : > { %v2690_v31 = vpop.eup %2689 }
 0x9eb   : > { %v1802_v32 = vmul.f32 %v2690_v31, %v1786_v17 }
 0x9ed   : > { %v1810_v39 = vmul.f32 %v2430_v34, %v1802_v32 }
 0x9ee   : > { %v2692_v35 = vpop.eup %2691 }
 0x9ef   : > { %v1803_v36 = vmul.f32 %v2692_v35, %v1787_v37  ;;  %v1818_v42 = vadd.f32 %v2431_v40, %v1810_v39  ;;  %v2442_v39 = vld [vmem:[%s961_s20] ss:$0 sm:$0xff] }
 0x9f1   : > { %v1811_v41 = vmul.f32 %v2430_v34, %v1803_v36 }
 0x9f3   : > { %v1819_v43 = vadd.f32 %v2431_v40, %v1811_v41  ;;  %v2443_v41 = vld [vmem:[%s964_s27] ss:$0 sm:$0xff] }
 0x9f5   : > { %v1820_v44 = vpack.c.bf16 %v1819_v43, %v1818_v42 }
 0x9f7   : > { %2588 = vmatmul.mubr.msk.bf16.vlgmr.msra.gmra.mxu0 %vm1047_vm2, %v1820_v44 }
 0xab7   : > { %v1881_v50 = vpop.f32.mrf.mxu0 }
 0xab8   : > { %v1882_v51 = vadd.f32 %v2432_v49, %v1881_v50 }
 0xab9   : > { %v2589_v52 = vpop.f32.mrf.mxu0 }
 0xaba   : > { %v1890_v53 = vmul.f32 0.044715, %v1882_v51  ;;  %v1888_v56 = vmul.f32 0.5, %v1882_v51 }
 0xabb   : > { %v1884_v54 = vpop.f32.mrf.mxu0 }
 0xabc   : > { %v1892_v55 = vmul.f32 %v1890_v53, %v1882_v51  ;;  %v1885_v57 = vadd.f32 %v2432_v49, %v1884_v54 }
 0xabd   : > { %v2590_v58 = vpop.f32.mrf.mxu0 }
 0xabe   : > { %v1894_v59 = vmul.f32 %v1892_v55, %v1882_v51  ;;  %v1891_v60 = vmul.f32 0.044715, %v1885_v57  ;;  %v1889_v6 = vmul.f32 0.5, %v1885_v57 }
 0xac0   : > { %v1896_v61 = vadd.f32 %v1894_v59, %v1882_v51  ;;  %v1893_v63 = vmul.f32 %v1891_v60, %v1885_v57 }
 0xac2   : > { %v1898_v0 = vmul.f32 0.7978846, %v1896_v61  ;;  %v1895_v33 = vmul.f32 %v1893_v63, %v1885_v57 }
 0xac4   : > { %2693 = vtanh.f32 %v1898_v0  ;;  %v1897_v1 = vadd.f32 %v1895_v33, %v1885_v57 }
 0xac6   : > { %v1899_v2 = vmul.f32 0.7978846, %v1897_v1 }
 0xac8   : > { %2695 = vtanh.f32 %v1899_v2 }
 0xad1   : > { %v2694_v3 = vpop.eup %2693 }
 0xad2   : > { %v1902_v4 = vadd.f32 1.0, %v2694_v3 }
 0xad4   : > { %v1904_v9 = vmul.f32 %v1902_v4, %v1888_v56 }
 0xad5   : > { %v2696_v5 = vpop.eup %2695 }
 0xad6   : > { %v1903_v8 = vadd.f32 1.0, %v2696_v5 }
 0xad8   : > { %v1905_v10 = vmul.f32 %v1903_v8, %v1889_v6 }
 0xada   : > { %v1906_v7 = vpack.c.bf16 %v1905_v10, %v1904_v9 }
 0xadc   : > { %2600 = vmatmul.mubr.msk.bf16.vlgmr.msra.gmra.mxu1 %vm1946_vm6, %v1906_v7 }
 0xb9c   : > { %v1984_v12 = vpop.f32.mrf.mxu1 }
 0xb9d   : > { %v1985_v13 = vadd.f32 %v2436_v11, %v1984_v12 }
 0xb9e   : > { %v2601_v14 = vpop.f32.mrf.mxu1 }
 0xb9f   : > { %v1991_v15 = vadd.f32 %v1985_v13, %v1818_v42 }
 0xba0   : > { %v1987_v62 = vpop.f32.mrf.mxu1 }
 0xba1   : > { %v1988_v16 = vadd.f32 %v2436_v11, %v1987_v62  ;;  %v1995_v17 = vsel %vm1047_vm2, %v1991_v15, 0.0 }
 0xba2   : > { %1996 = vadd.xlane.f32.xlu0 %v1995_v17  ;;  %v2602_v18 = vpop.f32.mrf.mxu1 }
 0xba3   : > { %v1992_v19 = vadd.f32 %v1988_v16, %v1819_v43 }
 0xba5   : > { %v1998_v20 = vsel %vm1047_vm2, %v1992_v19, 0.0 }
 0xba6   : > { %1999 = vadd.xlane.f32.xlu0 %v1998_v20 }
 0xc2b   : > { %v1997_v37 = vpop.xlane.xlu0 %1996 }
 0xc2c   : > { %v2001_v21 = vmul.f32 0.03125, %v1997_v37 }
 0xc2e   : > { %v2003_v22 = vsub.f32 %v1991_v15, %v2001_v21 }
 0xc2f   : > { %v2000_v23 = vpop.xlane.xlu0 %1999 }
 0xc30   : > { %v2002_v38 = vmul.f32 0.03125, %v2000_v23  ;;  %v2005_v24 = vmul.f32 %v2003_v22, %v2003_v22 }
 0xc32   : > { %v2004_v25 = vsub.f32 %v1992_v19, %v2002_v38  ;;  %v2007_v26 = vsel %vm1047_vm2, %v2005_v24, 0.0 }
 0xc33   : > { %2008 = vadd.xlane.f32.xlu0 %v2007_v26 }
 0xc34   : > { %v2006_v27 = vmul.f32 %v2004_v25, %v2004_v25 }
 0xc36   : > { %v2010_v28 = vsel %vm1047_vm2, %v2006_v27, 0.0 }
 0xc37   : > { %2011 = vadd.xlane.f32.xlu0 %v2010_v28 }
 0xcbc   : > { %v2009_v29 = vpop.xlane.xlu0 %2008 }
 0xcbd   : > { %v2013_v30 = vmul.f32 0.03125, %v2009_v29 }
 0xcbf   : > { %v2015_v31 = vadd.f32 1e-12, %v2013_v30 }
 0xcc0   : > { %v2012_v32 = vpop.xlane.xlu0 %2011 }
 0xcc1   : > { %2697 = vrsqrt.f32 %v2015_v31  ;;  %v2014_v34 = vmul.f32 0.03125, %v2012_v32 }
 0xcc3   : > { %v2016_v35 = vadd.f32 1e-12, %v2014_v34 }
 0xcc5   : > { %2699 = vrsqrt.f32 %v2016_v35 }
 0xcce   : > { %v2698_v36 = vpop.eup %2697 }
 0xccf   : > { %v2019_v40 = vmul.f32 %v2698_v36, %v2003_v22 }
 0xcd1   : > { %v2027_v42 = vmul.f32 %v2442_v39, %v2019_v40 }
 0xcd2   : > { %v2700_v43 = vpop.eup %2699 }
 0xcd3   : > { %v2035_v44 = vadd.f32 %v2443_v41, %v2027_v42  ;;  %v2020_v45 = vmul.f32 %v2700_v43, %v2004_v25 }
 0xcd5   : > { %2037 = vst.msk [vmem:[#allocation2] sm:$0xff] %vm1047_vm2, %v2035_v44  ;;  %v2028_v46 = vmul.f32 %v2442_v39, %v2020_v45  ;;  %2042 = sbr.rel (%p2444_p5) target bundleno = 3768 (0xeb8), region = 124 }
 0xcd7   : > { %v2036_v47 = vadd.f32 %v2443_v41, %v2028_v46 }
 0xcd9   : > { %2038 = vst.msk [vmem:[#allocation2 + $0x8] sm:$0xff] %vm1047_vm2, %v2036_v47 }
 0xcda   : > { %v2701_v48 = vld [vmem:[%s3252_s29 + $0x8] sm:$0xff]   ;;  %v2725_v49 = vmov 0.0   ;;  %v2702_v50 = vld [vmem:[%s3252_s29] sm:$0xff]   ;;  %vm2726_vm7 = vmmov 0   ;;  %v2044_v51 = vrot.slane %v2036_v47, 7  ;;  %vm2046_vm8 = vcmask 1040384  }
 0xcdb   : > { %2603 = vmatprep.subr.bf16.mxu0 %v2725_v49  ;;  %2611 = vmatprep.subr.bf16.mxu1 %v2725_v49  ;;  %v2703_v54 = vld [vmem:[%s3253_s6 + $0x8] sm:$0xff]   ;;  %v2704_v55 = vld [vmem:[%s3253_s6] sm:$0xff]   ;;  %v2449_v1 = vld [vmem:[#allocation3] ss:$0 sm:$0xff]  ;;  %vm2183_vm9 = vcmask 1024   ;;  %vm2203_vm10 = vcmask 7168  }
 0xcdc   : > { %2604 = vmatpush3.bf16.msra.mxu0 %v2701_v48  ;;  %2607 = vmatprep.mubr.msk.bf16.mxu0 %vm2726_vm7, %v2725_v49  ;;  %v2047_v52 = vsel %vm2046_vm8, %v2035_v44, %v2044_v51  ;;  %v2445_v57 = vld [vmem:[%s3254_s26] ss:$0 sm:$0xff]  ;;  %vm2205_vm11 = vcmask 1041408  }
 0xcdd   : > { %2605 = vmatprep.subr.bf16.mxu0 %v2725_v49  ;;  %2615 = vmatprep.mubr.msk.bf16.mxu1 %vm2726_vm7, %v2725_v49  ;;  %v2048_v53 = vpack.c.bf16 %v2047_v52, %v2047_v52 }
 0xcde   : > { %2612 = vmatpush3.bf16.msra.mxu1 %v2703_v54 }
 0xcdf   : > { %2613 = vmatprep.subr.bf16.mxu1 %v2725_v49 }
 0xce0   : > { %2606 = vmatpush3.bf16.msra.mxu0 %v2702_v50 }
 0xce2   : > { %2614 = vmatpush3.bf16.msra.mxu1 %v2704_v55 }
 0xce3   : > { %2608 = vmatmul.mubr.msk.bf16.vlgmr.msra.gmra.mxu0 %vm1047_vm2, %v2048_v53 }
 0xda3   : > { %v2109_v58 = vpop.f32.mrf.mxu0 }
 0xda4   : > { %v2110_v59 = vadd.f32 %v2445_v57, %v2109_v58 }
 0xda5   : > { %v2609_v60 = vpop.f32.mrf.mxu0 }
 0xda6   : > { %2705 = vtanh.f32 %v2110_v59 }
 0xda7   : > { %v2112_v61 = vpop.f32.mrf.mxu0 }
 0xda9   : > { %v2610_v63 = vpop.f32.mrf.mxu0 }
 0xdb3   : > { %v2706_v0 = vpop.eup %2705 }
 0xdb4   : > { %v2116_v33 = vpack.c.bf16 %v2706_v0, %v2706_v0 }
 0xdb6   : > { %2616 = vmatmul.mubr.msk.bf16.vlgmr.msra.gmra.mxu1 %vm1047_vm2, %v2116_v33 }
 0xe76   : > { %v2177_v2 = vpop.f32.mrf.mxu1 }
 0xe77   : > { %v2178_v3 = vadd.f32 %v2449_v1, %v2177_v2 }
 0xe78   : > { %v2617_v4 = vpop.f32.mrf.mxu1 }
 0xe79   : > { %v2184_v5 = vsel %vm2183_vm9, %v2178_v3, -inf }
 0xe7a   : > { %v2185_v56 = vrot.slane %v2184_v5, 4  ;;  %v2180_v6 = vpop.f32.mrf.mxu1 }
 0xe7c   : > { %v2186_v8 = vmax.f32 %v2184_v5, %v2185_v56  ;;  %v2618_v9 = vpop.f32.mrf.mxu1 }
 0xe7e   : > { %v2187_v10 = vrot.slane %v2186_v8, 2 }
 0xe80   : > { %v2188_v7 = vmax.f32 %v2186_v8, %v2187_v10 }
 0xe82   : > { %v2189_v11 = vrot.slane %v2188_v7, 1 }
 0xe84   : > { %v2190_v12 = vmax.f32 %v2188_v7, %v2189_v11 }
 0xe86   : > { %v2191_v13 = vsub.f32 %v2178_v3, %v2190_v12 }
 0xe88   : > { %v2192_v14 = vmul.f32 1.442695, %v2191_v13 }
 0xe8a   : > { %2707 = vpow2.f32 %v2192_v14 }
 0xe97   : > { %v2708_v15 = vpop.eup %2707 }
 0xe98   : > { %v2194_v62 = vsel %vm2183_vm9, %v2708_v15, 0.0 }
 0xe99   : > { %v2195_v16 = vrot.slane %v2194_v62, 4 }
 0xe9b   : > { %v2196_v17 = vadd.f32 %v2195_v16, %v2194_v62 }
 0xe9d   : > { %v2197_v18 = vrot.slane %v2196_v17, 2 }
 0xe9f   : > { %v2198_v19 = vadd.f32 %v2197_v18, %v2196_v17 }
 0xea1   : > { %v2199_v20 = vrot.slane %v2198_v19, 1 }
 0xea3   : > { %v2200_v37 = vadd.f32 %v2199_v20, %v2198_v19 }
 0xea5   : > { %2709 = vrcp.f32 %v2200_v37 }
 0xeb2   : > { %v2710_v21 = vpop.eup %2709 }
 0xeb3   : > { %v2202_v22 = vmul.f32 %v2710_v21, %v2708_v15 }
 0xeb5   : > { %v2204_v23 = vsel %vm2203_vm10, %v2202_v22, 0.0 }
 0xeb6   : > { %v2206_v38 = vsel %vm2205_vm11, %v2204_v23, 0.0 }
 0xeb7   : > { %2207 = vst [vmem:[%s3255_s24] sm:$0xff] %v2206_v38 }
 0xeb8 PF: > { %s3256_s30 = sld [smem:[#allocation4_spill]] }
 0xebe   : > { %s36_s27 = sadd.s32 1, %s3256_s30  }
 0xebf   : > { %p33_p6 = scmp.ge.s32.totalorder %s36_s27, 4  }
 0xec1   :  { %35 = sbr.rel (!%p33_p6) target bundleno = 15 (0xf), region = 195 }

</bundles_post_ra>
